<compile_context>
chip_gen: v5e
topology: v5e:2x2
jax: 0.10.0
libtpu: 0.0.40
codegen_flags: <defaults>
</compile_context>

<pallas_src>
import math

import jax
import jax.numpy as jnp
from jax.experimental import pallas as pl
from jax.experimental.pallas import tpu as pltpu

# ----------------------------- configuration --------------------------------
N_BATCH = 2
IN_CHANNELS = 3
H = W = 4                      # input_dim = H*W = 16
MAX_FREQ = 8
NUM_FREQ_BANDS = 4
NUM_ITERATIONS = 1
NUM_TRANSFORMER_BLOCKS = 2
NUM_LATENTS = 8
LATENT_DIM = 32
CROSS_HEADS = 1
CROSS_DIM_HEAD = 8
LATENT_HEADS = 2
LATENT_DIM_HEAD = 8
FF_MULT = 4

HW = H * W
CF = IN_CHANNELS * (2 * NUM_FREQ_BANDS + 1)           # input_channels * 9 = 27
FF_HIDDEN = FF_MULT * LATENT_DIM                      # 128
CROSS_INNER = CROSS_HEADS * CROSS_DIM_HEAD            # 8
LATENT_INNER = LATENT_HEADS * LATENT_DIM_HEAD         # 16
LN_EPS = 1e-5


# ------------------------------ fused forward kernel --------------------------
def make_fused_forward(n, hw, cf):
    """One pallas_call (grid=(1,)) computing the whole batched forward pass."""
    d = LATENT_DIM
    l = NUM_LATENTS
    ffh = FF_HIDDEN
    ci = CROSS_INNER
    li = LATENT_INNER
    nc = NUM_ITERATIONS
    nb = NUM_ITERATIONS * NUM_TRANSFORMER_BLOCKS
    inv_f = 1.0 / float(hw * cf)

    # ---- in-kernel math helpers ----
    def _layer_norm(x, gamma, beta):
        mu = jnp.mean(x, axis=-1, keepdims=True)
        var = jnp.mean(jnp.square(x - mu), axis=-1, keepdims=True)
        return (x - mu) * jax.lax.rsqrt(var + LN_EPS) * gamma + beta

    def _mha(q_all, k_all, v_all, kv_len, num_heads, dim_head):
        """Multi-head attention, unrolled over the (tiny) batch.

        q_all: (n*l, heads*dim_head); k_all/v_all: (n*kv_len, heads*dim_head).
        Softmax normalization is applied AFTER the PV matmul on the small
        (l, dim_head) result; heads concatenated in vregs (no VMEM scratch).
        The softmax scale (dim_head**-0.5) is pre-folded into Wq upstream.
        """
        sample_outs = []
        for i in range(n):
            qi = q_all[i * l:(i + 1) * l]
            ki = k_all[i * kv_len:(i + 1) * kv_len]
            vi = v_all[i * kv_len:(i + 1) * kv_len]
            head_outs = []
            for h in range(num_heads):
                sl = slice(h * dim_head, (h + 1) * dim_head)
                s = jax.lax.dot_general(qi[:, sl], ki[:, sl],
                                        (((1,), (1,)), ((), ())),
                                        preferred_element_type=jnp.float32)
                s = s - jnp.max(s, axis=-1, keepdims=True)
                p = jnp.exp(s)
                denom = jnp.sum(p, axis=-1, keepdims=True)
                o = jnp.dot(p, vi[:, sl], preferred_element_type=jnp.float32)
                head_outs.append(o * pl.reciprocal(denom, approx=True))
            sample_outs.append(head_outs[0] if num_heads == 1
                               else jnp.concatenate(head_outs, axis=-1))
        return jnp.concatenate(sample_outs, axis=0)      # (n*l, heads*dim_head)

    def _ffn(x, gamma, beta, w1, b1, w2, b2):
        xn = _layer_norm(x, gamma, beta)
        h1 = jnp.dot(xn, w1, preferred_element_type=jnp.float32) + b1
        # TODO(synk): PyTorch nn.GELU defaults to the exact erf form; tanh approx here.
        h1 = jax.nn.gelu(h1, approximate=True)
        return jnp.dot(h1, w2, preferred_element_type=jnp.float32) + b2 + x

    # ---- packed (1,d)/(1,ffh) vector row layout (must match the wrapper) ----
    def cell_rows(c):
        base = 6 * c
        return dict(ln_lat_g=base, ln_lat_b=base + 1, ca_bo=base + 2,
                    ln_cf_g=base + 3, ln_cf_b=base + 4, cf_b2=base + 5)

    def block_rows(i):
        base = 6 * nc + 6 * i
        return dict(ln0_g=base, ln0_b=base + 1, sa_bo=base + 2,
                    ln1_g=base + 3, ln1_b=base + 4, bf_b2=base + 5)

    def kernel(ctx_ref, lat_ref, vd_ref, vf_ref, dln_ref,
               caq_ref, cakv_ref, w1_ref, cout_ref, bqkv_ref, bout_ref,
               o_ref):
        vd = vd_ref[...]                    # (6*nc+6*nb, d) packed LN/bias rows
        vf = vf_ref[...]                    # (nc+nb, ffh)   packed FFN b1 rows
        row = lambda r: vd[r:r + 1, :]

        x = lat_ref[...]                    # (n*l, d) batched latent slab

        for c in range(nc):
            cr = cell_rows(c)

            # Data LayerNorm over the flattened (hw*cf) vector, computed on the
            # (hw, cf) tile per sample (identical statistics), fused here.
            dl = dln_ref[c]                 # (2*hw, cf): gamma rows | beta rows
            g_d, b_d = dl[:hw], dl[hw:]
            ctx_parts = []
            for i in range(n):
                raw = ctx_ref[i]            # (hw, cf)
                rsum = jnp.sum(raw, axis=-1, keepdims=True)
                mu = jnp.sum(rsum, axis=0, keepdims=True) * inv_f
                dev = raw - mu
                rsq = jnp.sum(dev * dev, axis=-1, keepdims=True)
                var = jnp.sum(rsq, axis=0, keepdims=True) * inv_f
                ctx_parts.append(dev * jax.lax.rsqrt(var + LN_EPS) * g_d + b_d)
            ctx_flat = jnp.concatenate(ctx_parts, axis=0)     # (n*hw, cf)

            # --- cross attention (1 head), batch-fused projections ---
            xn = _layer_norm(x, row(cr["ln_lat_g"]), row(cr["ln_lat_b"]))
            q_all = jnp.dot(xn, caq_ref[c], preferred_element_type=jnp.float32)
            cakv = cakv_ref[c]                                # (cf, 2*ci): Wk | Wv
            k_all = jnp.dot(ctx_flat, cakv[:, :ci],
                            preferred_element_type=jnp.float32)
            v_all = jnp.dot(ctx_flat, cakv[:, ci:],
                            preferred_element_type=jnp.float32)
            heads = _mha(q_all, k_all, v_all, hw, CROSS_HEADS, CROSS_DIM_HEAD)
            cout = cout_ref[c]                                # (ci+ffh, d): Wo | W2
            x = jnp.dot(heads, cout[:ci],
                        preferred_element_type=jnp.float32) + row(cr["ca_bo"]) + x

            # --- cell feed-forward ---
            x = _ffn(x, row(cr["ln_cf_g"]), row(cr["ln_cf_b"]),
                     w1_ref[c], vf[c:c + 1, :], cout[ci:], row(cr["cf_b2"]))

            # --- latent transformer blocks (self attention + feed-forward) ---
            for b in range(NUM_TRANSFORMER_BLOCKS):
                bi = c * NUM_TRANSFORMER_BLOCKS + b
                br = block_rows(bi)
                xn = _layer_norm(x, row(br["ln0_g"]), row(br["ln0_b"]))
                qkv = jnp.dot(xn, bqkv_ref[bi],
                              preferred_element_type=jnp.float32)  # (n*l, 3*li)
                heads = _mha(qkv[:, :li], qkv[:, li:2 * li], qkv[:, 2 * li:],
                             l, LATENT_HEADS, LATENT_DIM_HEAD)
                bout = bout_ref[bi]                            # (li+ffh, d): Wo | W2
                x = jnp.dot(heads, bout[:li],
                            preferred_element_type=jnp.float32) + row(br["sa_bo"]) + x
                x = _ffn(x, row(br["ln1_g"]), row(br["ln1_b"]),
                         w1_ref[nc + bi], vf[nc + bi:nc + bi + 1, :],
                         bout[li:], row(br["bf_b2"]))

        # x.mean(dim=-2): all N per-sample means written in one (n, d) store.
        means = [jnp.mean(x[i * l:(i + 1) * l], axis=0, keepdims=True)
                 for i in range(n)]
        o_ref[...] = jnp.concatenate(means, axis=0).astype(o_ref.dtype)

    def full(shape):
        return pl.BlockSpec(shape, lambda i: (0,) * len(shape))

    in_specs = [
        full((n, hw, cf)),                   # per-pixel fourier features
        full((n * l, d)),                    # batched latent init slab
        full((6 * nc + 6 * nb, d)),          # packed (1,d) LN gammas/betas/biases
        full((nc + nb, ffh)),                # packed (1,ffh) FFN b1 rows
        full((nc, 2 * hw, cf)),              # data LN gamma | beta
        full((nc, d, ci)),                   # cross Wq (softmax scale folded in)
        full((nc, cf, 2 * ci)),              # cross Wk | Wv
        full((nc + nb, d, ffh)),             # all FFN W1 (cells then blocks)
        full((nc, ci + ffh, d)),             # cross Wo | cell FFN W2
        full((nb, d, 3 * li)),               # self Wq | Wk | Wv (scale folded in)
        full((nb, li + ffh, d)),             # self Wo | block FFN W2
    ]

    return pl.pallas_call(
        kernel,
        out_shape=jax.ShapeDtypeStruct((n, d), jnp.float32),
        grid_spec=pltpu.PrefetchScalarGridSpec(
            num_scalar_prefetch=0,
            grid=(1,),                       # whole batch in one program
            in_specs=in_specs,
            out_specs=pl.BlockSpec((n, d), lambda i: (0, 0)),
        ),
        compiler_params=pltpu.CompilerParams(
            dimension_semantics=("arbitrary",)),
    )


# ------------------------------ glue (plain JAX) ------------------------------
def fourier_encode(x, max_freq, num_bands):
    # x: (N, HW, C) -> (N, HW, C, 2*num_bands + 1)
    orig = x[..., None]
    scales = jnp.linspace(1.0, max_freq / 2.0, num_bands, dtype=x.dtype)
    xs = orig * scales * math.pi
    return jnp.concatenate([jnp.sin(xs), jnp.cos(xs), orig], axis=-1)


def init_params(key):
    keys = iter(jax.random.split(key, 256))

    def lin(shape, scale=0.05):
        return scale * jax.random.normal(next(keys), shape, dtype=jnp.float32)

    ones = lambda s: jnp.ones(s, jnp.float32)
    zeros = lambda s: jnp.zeros(s, jnp.float32)
    d, cf, f = LATENT_DIM, CF, HW * CF

    cells = []
    for _ in range(NUM_ITERATIONS):
        blocks = []
        for _ in range(NUM_TRANSFORMER_BLOCKS):
            blocks.append(dict(
                ln0_g=ones((1, d)), ln0_b=zeros((1, d)),
                sa_wq=lin((d, LATENT_INNER)), sa_wk=lin((d, LATENT_INNER)),
                sa_wv=lin((d, LATENT_INNER)), sa_wo=lin((LATENT_INNER, d)),
                sa_bo=zeros((1, d)),
                ln1_g=ones((1, d)), ln1_b=zeros((1, d)),
                ff_w1=lin((d, FF_HIDDEN)), ff_b1=zeros((1, FF_HIDDEN)),
                ff_w2=lin((FF_HIDDEN, d)), ff_b2=zeros((1, d)),
            ))
        cells.append(dict(
            ln_lat_g=ones((1, d)), ln_lat_b=zeros((1, d)),
            ln_data_g=ones((1, f)), ln_data_b=zeros((1, f)),
            ca_wq=lin((d, CROSS_INNER)), ca_wk=lin((cf, CROSS_INNER)),
            ca_wv=lin((cf, CROSS_INNER)), ca_wo=lin((CROSS_INNER, d)),
            ca_bo=zeros((1, d)),
            ln_ff_g=ones((1, d)), ln_ff_b=zeros((1, d)),
            ff_w1=lin((d, FF_HIDDEN)), ff_b1=zeros((1, FF_HIDDEN)),
            ff_w2=lin((FF_HIDDEN, d)), ff_b2=zeros((1, d)),
            blocks=blocks,
        ))
    return dict(cells=cells)


def vision_perceiver_forward(params, data, latent_init):
    n, c, h, w = data.shape
    hw = h * w
    cf = c * (2 * NUM_FREQ_BANDS + 1)

    # data.view(N, C, -1).transpose(1, 2) -> (N, HW, C), then fourier encode.
    x3 = jnp.transpose(data.reshape(n, c, hw), (0, 2, 1))
    ctx = fourier_encode(x3, MAX_FREQ, NUM_FREQ_BANDS).reshape(n, hw, cf)

    cells = params["cells"]
    blocks = [blk for cell in cells for blk in cell["blocks"]]
    nc, nb = len(cells), len(blocks)

    # --- pack the tiny per-layer weights into a few stacked slabs -------------
    vd_rows = []
    for cell in cells:                        # order must match cell_rows()
        vd_rows += [cell["ln_lat_g"], cell["ln_lat_b"], cell["ca_bo"],
                    cell["ln_ff_g"], cell["ln_ff_b"], cell["ff_b2"]]
    for blk in blocks:                        # order must match block_rows()
        vd_rows += [blk["ln0_g"], blk["ln0_b"], blk["sa_bo"],
                    blk["ln1_g"], blk["ln1_b"], blk["ff_b2"]]
    vecs_d = jnp.concatenate(vd_rows, axis=0)                     # (6nc+6nb, d)

    vecs_ffh = jnp.concatenate(
        [cell["ff_b1"] for cell in cells] + [blk["ff_b1"] for blk in blocks],
        axis=0)                                                   # (nc+nb, ffh)

    data_ln = jnp.stack([jnp.concatenate(
        [cell["ln_data_g"].reshape(hw, cf), cell["ln_data_b"].reshape(hw, cf)],
        axis=0) for cell in cells], axis=0)                       # (nc, 2hw, cf)

    ca_q = jnp.stack([cell["ca_wq"] * (CROSS_DIM_HEAD ** -0.5)    # scale folded
                      for cell in cells], axis=0)
    ca_kv = jnp.stack([jnp.concatenate([cell["ca_wk"], cell["ca_wv"]], axis=1)
                       for cell in cells], axis=0)
    w1_all = jnp.stack([cell["ff_w1"] for cell in cells]
                       + [blk["ff_w1"] for blk in blocks], axis=0)
    cell_out = jnp.stack([jnp.concatenate([cell["ca_wo"], cell["ff_w2"]], axis=0)
                          for cell in cells], axis=0)
    blk_qkv = jnp.stack([jnp.concatenate(
        [blk["sa_wq"] * (LATENT_DIM_HEAD ** -0.5), blk["sa_wk"], blk["sa_wv"]],
        axis=1) for blk in blocks], axis=0)
    blk_out = jnp.stack([jnp.concatenate([blk["sa_wo"], blk["ff_w2"]], axis=0)
                         for blk in blocks], axis=0)

    # Shared latent init broadcast over the batch as an (N*L, D) slab.
    lat_slab = jnp.tile(jnp.asarray(latent_init, jnp.float32), (n, 1))

    fused = make_fused_forward(n, hw, cf)

    # NOTE: the reference forward has a typo (`la2tent_transformer`) that would
    # raise NameError; we implement the intended per-block iteration, and like
    # the reference we never apply `self.to_logits`.
    out = fused(ctx, lat_slab, vecs_d, vecs_ffh, data_ln,
                ca_q, ca_kv, w1_all, cell_out, blk_qkv, blk_out)  # (N, D)
    return out                                                    # x.mean(dim=-2)


# ----------------------------------- main -------------------------------------
if __name__ == "__main__":
    key = jax.random.PRNGKey(0)
    k_data, k_lat, k_par = jax.random.split(key, 3)

    data = jax.random.normal(k_data, (N_BATCH, IN_CHANNELS, H, W), dtype=jnp.float32)
    latent_init = jax.random.normal(k_lat, (NUM_LATENTS, LATENT_DIM), dtype=jnp.float32)
    params = init_params(k_par)

    fwd = jax.jit(vision_perceiver_forward)
    out = jax.block_until_ready(fwd(params, data, latent_init))

    assert out.shape == (N_BATCH, LATENT_DIM), out.shape
    assert bool(jnp.all(jnp.isfinite(out)))
    print("KERNEL_OK")
</pallas_src>

<mosaic_0001>
module attributes {stable_mosaic.version = 11 : i64} {
  func.func @kernel(%arg0: i32, %arg1: memref<2x16x27xf32, #tpu.memory_space<vmem>>, %arg2: memref<16x32xf32, #tpu.memory_space<vmem>>, %arg3: memref<18x32xf32, #tpu.memory_space<vmem>>, %arg4: memref<3x128xf32, #tpu.memory_space<vmem>>, %arg5: memref<1x32x27xf32, #tpu.memory_space<vmem>>, %arg6: memref<1x32x8xf32, #tpu.memory_space<vmem>>, %arg7: memref<1x27x16xf32, #tpu.memory_space<vmem>>, %arg8: memref<3x32x128xf32, #tpu.memory_space<vmem>>, %arg9: memref<1x136x32xf32, #tpu.memory_space<vmem>>, %arg10: memref<2x32x48xf32, #tpu.memory_space<vmem>>, %arg11: memref<2x144x32xf32, #tpu.memory_space<vmem>>, %arg12: memref<2x32xf32, #tpu.memory_space<vmem>>) attributes {dimension_semantics = [#tpu.dimension_semantics<arbitrary>], iteration_bounds = array<i64: 1>, scalar_prefetch = 0 : i64, scratch_operands = 0 : i64, tpu.core_type = #tpu.core_type<tc>, window_params = [{pipeline_mode = #tpu.pipeline_mode<synchronous>, transform_indices = @transform_0, window_bounds = array<i64: 2, 16, 27>}, {pipeline_mode = #tpu.pipeline_mode<synchronous>, transform_indices = @transform_1, window_bounds = array<i64: 16, 32>}, {pipeline_mode = #tpu.pipeline_mode<synchronous>, transform_indices = @transform_2, window_bounds = array<i64: 18, 32>}, {pipeline_mode = #tpu.pipeline_mode<synchronous>, transform_indices = @transform_3, window_bounds = array<i64: 3, 128>}, {pipeline_mode = #tpu.pipeline_mode<synchronous>, transform_indices = @transform_4, window_bounds = array<i64: 1, 32, 27>}, {pipeline_mode = #tpu.pipeline_mode<synchronous>, transform_indices = @transform_5, window_bounds = array<i64: 1, 32, 8>}, {pipeline_mode = #tpu.pipeline_mode<synchronous>, transform_indices = @transform_6, window_bounds = array<i64: 1, 27, 16>}, {pipeline_mode = #tpu.pipeline_mode<synchronous>, transform_indices = @transform_7, window_bounds = array<i64: 3, 32, 128>}, {pipeline_mode = #tpu.pipeline_mode<synchronous>, transform_indices = @transform_8, window_bounds = array<i64: 1, 136, 32>}, {pipeline_mode = #tpu.pipeline_mode<synchronous>, transform_indices = @transform_9, window_bounds = array<i64: 2, 32, 48>}, {pipeline_mode = #tpu.pipeline_mode<synchronous>, transform_indices = @transform_10, window_bounds = array<i64: 2, 144, 32>}, {pipeline_mode = #tpu.pipeline_mode<synchronous>, transform_indices = @transform_11, window_bounds = array<i64: 2, 32>}]} {
    %c0 = arith.constant 0 : index
    %c0_0 = arith.constant 0 : index
    %0 = vector.load %arg3[%c0, %c0_0] : memref<18x32xf32, #tpu.memory_space<vmem>>, vector<18x32xf32>
    %c0_1 = arith.constant 0 : index
    %c0_2 = arith.constant 0 : index
    %1 = vector.load %arg4[%c0_1, %c0_2] : memref<3x128xf32, #tpu.memory_space<vmem>>, vector<3x128xf32>
    %c0_3 = arith.constant 0 : index
    %c0_4 = arith.constant 0 : index
    %2 = vector.load %arg2[%c0_3, %c0_4] : memref<16x32xf32, #tpu.memory_space<vmem>>, vector<16x32xf32>
    %c0_5 = arith.constant 0 : index
    %c0_6 = arith.constant 0 : index
    %c0_7 = arith.constant 0 : index
    %3 = vector.load %arg5[%c0_5, %c0_6, %c0_7] : memref<1x32x27xf32, #tpu.memory_space<vmem>>, vector<1x32x27xf32>
    %4 = vector.shape_cast %3 : vector<1x32x27xf32> to vector<32x27xf32>
    %5 = vector.extract_strided_slice %4 {offsets = [0, 0], sizes = [16, 27], strides = [1, 1]} : vector<32x27xf32> to vector<16x27xf32>
    %6 = vector.extract_strided_slice %4 {offsets = [16, 0], sizes = [16, 27], strides = [1, 1]} : vector<32x27xf32> to vector<16x27xf32>
    %c0_8 = arith.constant 0 : index
    %c0_9 = arith.constant 0 : index
    %c0_10 = arith.constant 0 : index
    %7 = vector.load %arg1[%c0_8, %c0_9, %c0_10] : memref<2x16x27xf32, #tpu.memory_space<vmem>>, vector<1x16x27xf32>
    %8 = vector.shape_cast %7 : vector<1x16x27xf32> to vector<16x27xf32>
    %cst = arith.constant dense<0.000000e+00> : vector<16xf32>
    %9 = vector.multi_reduction <add>, %8, %cst [1] : vector<16x27xf32> to vector<16xf32>
    %10 = vector.shape_cast %9 : vector<16xf32> to vector<16x1xf32>
    %cst_11 = arith.constant dense<0.000000e+00> : vector<1xf32>
    %11 = vector.multi_reduction <add>, %10, %cst_11 [0] : vector<16x1xf32> to vector<1xf32>
    %12 = vector.shape_cast %11 : vector<1xf32> to vector<1x1xf32>
    %cst_12 = arith.constant 0.00231481483 : f32
    %13 = vector.broadcast %cst_12 : f32 to vector<1x1xf32>
    %14 = arith.mulf %12, %13 : vector<1x1xf32>
    %15 = vector.broadcast %14 : vector<1x1xf32> to vector<16x27xf32>
    %16 = arith.subf %8, %15 : vector<16x27xf32>
    %17 = arith.mulf %16, %16 : vector<16x27xf32>
    %cst_13 = arith.constant dense<0.000000e+00> : vector<16xf32>
    %18 = vector.multi_reduction <add>, %17, %cst_13 [1] : vector<16x27xf32> to vector<16xf32>
    %19 = vector.shape_cast %18 : vector<16xf32> to vector<16x1xf32>
    %cst_14 = arith.constant dense<0.000000e+00> : vector<1xf32>
    %20 = vector.multi_reduction <add>, %19, %cst_14 [0] : vector<16x1xf32> to vector<1xf32>
    %21 = vector.shape_cast %20 : vector<1xf32> to vector<1x1xf32>
    %cst_15 = arith.constant 0.00231481483 : f32
    %22 = vector.broadcast %cst_15 : f32 to vector<1x1xf32>
    %23 = arith.mulf %21, %22 : vector<1x1xf32>
    %cst_16 = arith.constant 9.99999974E-6 : f32
    %24 = vector.broadcast %cst_16 : f32 to vector<1x1xf32>
    %25 = arith.addf %23, %24 : vector<1x1xf32>
    %26 = math.rsqrt %25 : vector<1x1xf32>
    %27 = vector.broadcast %26 : vector<1x1xf32> to vector<16x27xf32>
    %28 = arith.mulf %16, %27 : vector<16x27xf32>
    %29 = arith.mulf %28, %5 : vector<16x27xf32>
    %30 = arith.addf %29, %6 : vector<16x27xf32>
    %c1 = arith.constant 1 : index
    %c0_17 = arith.constant 0 : index
    %c0_18 = arith.constant 0 : index
    %31 = vector.load %arg1[%c1, %c0_17, %c0_18] : memref<2x16x27xf32, #tpu.memory_space<vmem>>, vector<1x16x27xf32>
    %32 = vector.shape_cast %31 : vector<1x16x27xf32> to vector<16x27xf32>
    %cst_19 = arith.constant dense<0.000000e+00> : vector<16xf32>
    %33 = vector.multi_reduction <add>, %32, %cst_19 [1] : vector<16x27xf32> to vector<16xf32>
    %34 = vector.shape_cast %33 : vector<16xf32> to vector<16x1xf32>
    %cst_20 = arith.constant dense<0.000000e+00> : vector<1xf32>
    %35 = vector.multi_reduction <add>, %34, %cst_20 [0] : vector<16x1xf32> to vector<1xf32>
    %36 = vector.shape_cast %35 : vector<1xf32> to vector<1x1xf32>
    %cst_21 = arith.constant 0.00231481483 : f32
    %37 = vector.broadcast %cst_21 : f32 to vector<1x1xf32>
    %38 = arith.mulf %36, %37 : vector<1x1xf32>
    %39 = vector.broadcast %38 : vector<1x1xf32> to vector<16x27xf32>
    %40 = arith.subf %32, %39 : vector<16x27xf32>
    %41 = arith.mulf %40, %40 : vector<16x27xf32>
    %cst_22 = arith.constant dense<0.000000e+00> : vector<16xf32>
    %42 = vector.multi_reduction <add>, %41, %cst_22 [1] : vector<16x27xf32> to vector<16xf32>
    %43 = vector.shape_cast %42 : vector<16xf32> to vector<16x1xf32>
    %cst_23 = arith.constant dense<0.000000e+00> : vector<1xf32>
    %44 = vector.multi_reduction <add>, %43, %cst_23 [0] : vector<16x1xf32> to vector<1xf32>
    %45 = vector.shape_cast %44 : vector<1xf32> to vector<1x1xf32>
    %cst_24 = arith.constant 0.00231481483 : f32
    %46 = vector.broadcast %cst_24 : f32 to vector<1x1xf32>
    %47 = arith.mulf %45, %46 : vector<1x1xf32>
    %cst_25 = arith.constant 9.99999974E-6 : f32
    %48 = vector.broadcast %cst_25 : f32 to vector<1x1xf32>
    %49 = arith.addf %47, %48 : vector<1x1xf32>
    %50 = math.rsqrt %49 : vector<1x1xf32>
    %51 = vector.broadcast %50 : vector<1x1xf32> to vector<16x27xf32>
    %52 = arith.mulf %40, %51 : vector<16x27xf32>
    %53 = arith.mulf %52, %5 : vector<16x27xf32>
    %54 = arith.addf %53, %6 : vector<16x27xf32>
    %55 = tpu.concatenate %30, %54 in 0 : vector<16x27xf32>, vector<16x27xf32> -> vector<32x27xf32>
    %56 = vector.extract_strided_slice %0 {offsets = [0, 0], sizes = [1, 32], strides = [1, 1]} : vector<18x32xf32> to vector<1x32xf32>
    %57 = vector.extract_strided_slice %0 {offsets = [1, 0], sizes = [1, 32], strides = [1, 1]} : vector<18x32xf32> to vector<1x32xf32>
    %cst_26 = arith.constant dense<0.000000e+00> : vector<16xf32>
    %58 = vector.multi_reduction <add>, %2, %cst_26 [1] : vector<16x32xf32> to vector<16xf32>
    %59 = vector.shape_cast %58 : vector<16xf32> to vector<16x1xf32>
    %cst_27 = arith.constant 3.200000e+01 : f32
    %60 = vector.broadcast %cst_27 : f32 to vector<16x1xf32>
    %61 = arith.divf %59, %60 : vector<16x1xf32>
    %62 = vector.broadcast %61 : vector<16x1xf32> to vector<16x32xf32>
    %63 = arith.subf %2, %62 : vector<16x32xf32>
    %64 = arith.mulf %63, %63 : vector<16x32xf32>
    %cst_28 = arith.constant dense<0.000000e+00> : vector<16xf32>
    %65 = vector.multi_reduction <add>, %64, %cst_28 [1] : vector<16x32xf32> to vector<16xf32>
    %66 = vector.shape_cast %65 : vector<16xf32> to vector<16x1xf32>
    %cst_29 = arith.constant 3.200000e+01 : f32
    %67 = vector.broadcast %cst_29 : f32 to vector<16x1xf32>
    %68 = arith.divf %66, %67 : vector<16x1xf32>
    %69 = vector.broadcast %61 : vector<16x1xf32> to vector<16x32xf32>
    %70 = arith.subf %2, %69 : vector<16x32xf32>
    %cst_30 = arith.constant 9.99999974E-6 : f32
    %71 = vector.broadcast %cst_30 : f32 to vector<16x1xf32>
    %72 = arith.addf %68, %71 : vector<16x1xf32>
    %73 = math.rsqrt %72 : vector<16x1xf32>
    %74 = vector.broadcast %73 : vector<16x1xf32> to vector<16x32xf32>
    %75 = arith.mulf %70, %74 : vector<16x32xf32>
    %76 = vector.broadcast %56 : vector<1x32xf32> to vector<16x32xf32>
    %77 = arith.mulf %75, %76 : vector<16x32xf32>
    %78 = vector.broadcast %57 : vector<1x32xf32> to vector<16x32xf32>
    %79 = arith.addf %77, %78 : vector<16x32xf32>
    %c0_31 = arith.constant 0 : index
    %c0_32 = arith.constant 0 : index
    %c0_33 = arith.constant 0 : index
    %80 = vector.load %arg6[%c0_31, %c0_32, %c0_33] : memref<1x32x8xf32, #tpu.memory_space<vmem>>, vector<1x32x8xf32>
    %81 = vector.shape_cast %80 : vector<1x32x8xf32> to vector<32x8xf32>
    %cst_34 = arith.constant dense<0.000000e+00> : vector<16x8xf32>
    %82 = tpu.matmul %79, %81, %cst_34 {dimension_numbers = #tpu.dot_dimension_numbers<[1], [0], [0], [1], [0, 0, 1, 1], [], []>} : vector<16x32xf32>, vector<32x8xf32>, vector<16x8xf32> -> vector<16x8xf32>
    %c0_35 = arith.constant 0 : index
    %c0_36 = arith.constant 0 : index
    %c0_37 = arith.constant 0 : index
    %83 = vector.load %arg7[%c0_35, %c0_36, %c0_37] : memref<1x27x16xf32, #tpu.memory_space<vmem>>, vector<1x27x16xf32>
    %84 = vector.shape_cast %83 : vector<1x27x16xf32> to vector<27x16xf32>
    %85 = vector.extract_strided_slice %84 {offsets = [0, 0], sizes = [27, 8], strides = [1, 1]} : vector<27x16xf32> to vector<27x8xf32>
    %cst_38 = arith.constant dense<0.000000e+00> : vector<32x8xf32>
    %86 = tpu.matmul %55, %85, %cst_38 {dimension_numbers = #tpu.dot_dimension_numbers<[1], [0], [0], [1], [0, 0, 1, 1], [], []>} : vector<32x27xf32>, vector<27x8xf32>, vector<32x8xf32> -> vector<32x8xf32>
    %87 = vector.extract_strided_slice %84 {offsets = [0, 8], sizes = [27, 8], strides = [1, 1]} : vector<27x16xf32> to vector<27x8xf32>
    %cst_39 = arith.constant dense<0.000000e+00> : vector<32x8xf32>
    %88 = tpu.matmul %55, %87, %cst_39 {dimension_numbers = #tpu.dot_dimension_numbers<[1], [0], [0], [1], [0, 0, 1, 1], [], []>} : vector<32x27xf32>, vector<27x8xf32>, vector<32x8xf32> -> vector<32x8xf32>
    %89 = vector.extract_strided_slice %82 {offsets = [0, 0], sizes = [8, 8], strides = [1, 1]} : vector<16x8xf32> to vector<8x8xf32>
    %90 = vector.extract_strided_slice %86 {offsets = [0, 0], sizes = [16, 8], strides = [1, 1]} : vector<32x8xf32> to vector<16x8xf32>
    %91 = vector.extract_strided_slice %88 {offsets = [0, 0], sizes = [16, 8], strides = [1, 1]} : vector<32x8xf32> to vector<16x8xf32>
    %cst_40 = arith.constant dense<0.000000e+00> : vector<8x16xf32>
    %92 = tpu.matmul %89, %90, %cst_40 {dimension_numbers = #tpu.dot_dimension_numbers<[1], [1], [0], [0], [0, 0, 1, 0], [], []>} : vector<8x8xf32>, vector<16x8xf32>, vector<8x16xf32> -> vector<8x16xf32>
    %cst_41 = arith.constant dense<0xFF800000> : vector<8xf32>
    %93 = vector.multi_reduction <maximumf>, %92, %cst_41 [1] : vector<8x16xf32> to vector<8xf32>
    %94 = vector.shape_cast %93 : vector<8xf32> to vector<8x1xf32>
    %95 = vector.broadcast %94 : vector<8x1xf32> to vector<8x16xf32>
    %96 = arith.subf %92, %95 : vector<8x16xf32>
    %97 = math.exp %96 : vector<8x16xf32>
    %cst_42 = arith.constant dense<0.000000e+00> : vector<8xf32>
    %98 = vector.multi_reduction <add>, %97, %cst_42 [1] : vector<8x16xf32> to vector<8xf32>
    %99 = vector.shape_cast %98 : vector<8xf32> to vector<8x1xf32>
    %cst_43 = arith.constant dense<0.000000e+00> : vector<8x8xf32>
    %100 = tpu.matmul %97, %91, %cst_43 {dimension_numbers = #tpu.dot_dimension_numbers<[1], [0], [0], [1], [0, 0, 1, 1], [], []>} : vector<8x16xf32>, vector<16x8xf32>, vector<8x8xf32> -> vector<8x8xf32>
    %101 = tpu.reciprocal %99 {approx = true} : vector<8x1xf32> -> vector<8x1xf32>
    %102 = vector.broadcast %101 : vector<8x1xf32> to vector<8x8xf32>
    %103 = arith.mulf %100, %102 : vector<8x8xf32>
    %104 = vector.extract_strided_slice %82 {offsets = [8, 0], sizes = [8, 8], strides = [1, 1]} : vector<16x8xf32> to vector<8x8xf32>
    %105 = vector.extract_strided_slice %86 {offsets = [16, 0], sizes = [16, 8], strides = [1, 1]} : vector<32x8xf32> to vector<16x8xf32>
    %106 = vector.extract_strided_slice %88 {offsets = [16, 0], sizes = [16, 8], strides = [1, 1]} : vector<32x8xf32> to vector<16x8xf32>
    %cst_44 = arith.constant dense<0.000000e+00> : vector<8x16xf32>
    %107 = tpu.matmul %104, %105, %cst_44 {dimension_numbers = #tpu.dot_dimension_numbers<[1], [1], [0], [0], [0, 0, 1, 0], [], []>} : vector<8x8xf32>, vector<16x8xf32>, vector<8x16xf32> -> vector<8x16xf32>
    %cst_45 = arith.constant dense<0xFF800000> : vector<8xf32>
    %108 = vector.multi_reduction <maximumf>, %107, %cst_45 [1] : vector<8x16xf32> to vector<8xf32>
    %109 = vector.shape_cast %108 : vector<8xf32> to vector<8x1xf32>
    %110 = vector.broadcast %109 : vector<8x1xf32> to vector<8x16xf32>
    %111 = arith.subf %107, %110 : vector<8x16xf32>
    %112 = math.exp %111 : vector<8x16xf32>
    %cst_46 = arith.constant dense<0.000000e+00> : vector<8xf32>
    %113 = vector.multi_reduction <add>, %112, %cst_46 [1] : vector<8x16xf32> to vector<8xf32>
    %114 = vector.shape_cast %113 : vector<8xf32> to vector<8x1xf32>
    %cst_47 = arith.constant dense<0.000000e+00> : vector<8x8xf32>
    %115 = tpu.matmul %112, %106, %cst_47 {dimension_numbers = #tpu.dot_dimension_numbers<[1], [0], [0], [1], [0, 0, 1, 1], [], []>} : vector<8x16xf32>, vector<16x8xf32>, vector<8x8xf32> -> vector<8x8xf32>
    %116 = tpu.reciprocal %114 {approx = true} : vector<8x1xf32> -> vector<8x1xf32>
    %117 = vector.broadcast %116 : vector<8x1xf32> to vector<8x8xf32>
    %118 = arith.mulf %115, %117 : vector<8x8xf32>
    %119 = tpu.concatenate %103, %118 in 0 : vector<8x8xf32>, vector<8x8xf32> -> vector<16x8xf32>
    %c0_48 = arith.constant 0 : index
    %c0_49 = arith.constant 0 : index
    %c0_50 = arith.constant 0 : index
    %120 = vector.load %arg9[%c0_48, %c0_49, %c0_50] : memref<1x136x32xf32, #tpu.memory_space<vmem>>, vector<1x136x32xf32>
    %121 = vector.shape_cast %120 : vector<1x136x32xf32> to vector<136x32xf32>
    %122 = vector.extract_strided_slice %121 {offsets = [0, 0], sizes = [8, 32], strides = [1, 1]} : vector<136x32xf32> to vector<8x32xf32>
    %cst_51 = arith.constant dense<0.000000e+00> : vector<16x32xf32>
    %123 = tpu.matmul %119, %122, %cst_51 {dimension_numbers = #tpu.dot_dimension_numbers<[1], [0], [0], [1], [0, 0, 1, 1], [], []>} : vector<16x8xf32>, vector<8x32xf32>, vector<16x32xf32> -> vector<16x32xf32>
    %124 = vector.extract_strided_slice %0 {offsets = [2, 0], sizes = [1, 32], strides = [1, 1]} : vector<18x32xf32> to vector<1x32xf32>
    %125 = vector.broadcast %124 : vector<1x32xf32> to vector<16x32xf32>
    %126 = arith.addf %123, %125 : vector<16x32xf32>
    %127 = arith.addf %126, %2 : vector<16x32xf32>
    %128 = vector.extract_strided_slice %0 {offsets = [3, 0], sizes = [1, 32], strides = [1, 1]} : vector<18x32xf32> to vector<1x32xf32>
    %129 = vector.extract_strided_slice %0 {offsets = [4, 0], sizes = [1, 32], strides = [1, 1]} : vector<18x32xf32> to vector<1x32xf32>
    %c0_52 = arith.constant 0 : index
    %c0_53 = arith.constant 0 : index
    %c0_54 = arith.constant 0 : index
    %130 = vector.load %arg8[%c0_52, %c0_53, %c0_54] : memref<3x32x128xf32, #tpu.memory_space<vmem>>, vector<1x32x128xf32>
    %131 = vector.shape_cast %130 : vector<1x32x128xf32> to vector<32x128xf32>
    %132 = vector.extract_strided_slice %1 {offsets = [0, 0], sizes = [1, 128], strides = [1, 1]} : vector<3x128xf32> to vector<1x128xf32>
    %133 = vector.extract_strided_slice %121 {offsets = [8, 0], sizes = [128, 32], strides = [1, 1]} : vector<136x32xf32> to vector<128x32xf32>
    %134 = vector.extract_strided_slice %0 {offsets = [5, 0], sizes = [1, 32], strides = [1, 1]} : vector<18x32xf32> to vector<1x32xf32>
    %cst_55 = arith.constant dense<0.000000e+00> : vector<16xf32>
    %135 = vector.multi_reduction <add>, %127, %cst_55 [1] : vector<16x32xf32> to vector<16xf32>
    %136 = vector.shape_cast %135 : vector<16xf32> to vector<16x1xf32>
    %cst_56 = arith.constant 3.200000e+01 : f32
    %137 = vector.broadcast %cst_56 : f32 to vector<16x1xf32>
    %138 = arith.divf %136, %137 : vector<16x1xf32>
    %139 = vector.broadcast %138 : vector<16x1xf32> to vector<16x32xf32>
    %140 = arith.subf %127, %139 : vector<16x32xf32>
    %141 = arith.mulf %140, %140 : vector<16x32xf32>
    %cst_57 = arith.constant dense<0.000000e+00> : vector<16xf32>
    %142 = vector.multi_reduction <add>, %141, %cst_57 [1] : vector<16x32xf32> to vector<16xf32>
    %143 = vector.shape_cast %142 : vector<16xf32> to vector<16x1xf32>
    %cst_58 = arith.constant 3.200000e+01 : f32
    %144 = vector.broadcast %cst_58 : f32 to vector<16x1xf32>
    %145 = arith.divf %143, %144 : vector<16x1xf32>
    %146 = vector.broadcast %138 : vector<16x1xf32> to vector<16x32xf32>
    %147 = arith.subf %127, %146 : vector<16x32xf32>
    %cst_59 = arith.constant 9.99999974E-6 : f32
    %148 = vector.broadcast %cst_59 : f32 to vector<16x1xf32>
    %149 = arith.addf %145, %148 : vector<16x1xf32>
    %150 = math.rsqrt %149 : vector<16x1xf32>
    %151 = vector.broadcast %150 : vector<16x1xf32> to vector<16x32xf32>
    %152 = arith.mulf %147, %151 : vector<16x32xf32>
    %153 = vector.broadcast %128 : vector<1x32xf32> to vector<16x32xf32>
    %154 = arith.mulf %152, %153 : vector<16x32xf32>
    %155 = vector.broadcast %129 : vector<1x32xf32> to vector<16x32xf32>
    %156 = arith.addf %154, %155 : vector<16x32xf32>
    %cst_60 = arith.constant dense<0.000000e+00> : vector<16x128xf32>
    %157 = tpu.matmul %156, %131, %cst_60 {dimension_numbers = #tpu.dot_dimension_numbers<[1], [0], [0], [1], [0, 0, 1, 1], [], []>} : vector<16x32xf32>, vector<32x128xf32>, vector<16x128xf32> -> vector<16x128xf32>
    %158 = vector.broadcast %132 : vector<1x128xf32> to vector<16x128xf32>
    %159 = arith.addf %157, %158 : vector<16x128xf32>
    %160 = arith.mulf %159, %159 : vector<16x128xf32>
    %161 = arith.mulf %159, %160 : vector<16x128xf32>
    %cst_61 = arith.constant 4.471500e-02 : f32
    %162 = vector.broadcast %cst_61 : f32 to vector<16x128xf32>
    %163 = arith.mulf %162, %161 : vector<16x128xf32>
    %164 = arith.addf %159, %163 : vector<16x128xf32>
    %cst_62 = arith.constant 0.797884583 : f32
    %165 = vector.broadcast %cst_62 : f32 to vector<16x128xf32>
    %166 = arith.mulf %165, %164 : vector<16x128xf32>
    %167 = math.tanh %166 : vector<16x128xf32>
    %cst_63 = arith.constant 1.000000e+00 : f32
    %168 = vector.broadcast %cst_63 : f32 to vector<16x128xf32>
    %169 = arith.addf %168, %167 : vector<16x128xf32>
    %cst_64 = arith.constant 5.000000e-01 : f32
    %170 = vector.broadcast %cst_64 : f32 to vector<16x128xf32>
    %171 = arith.mulf %170, %169 : vector<16x128xf32>
    %172 = arith.mulf %159, %171 : vector<16x128xf32>
    %cst_65 = arith.constant dense<0.000000e+00> : vector<16x32xf32>
    %173 = tpu.matmul %172, %133, %cst_65 {dimension_numbers = #tpu.dot_dimension_numbers<[1], [0], [0], [1], [0, 0, 1, 1], [], []>} : vector<16x128xf32>, vector<128x32xf32>, vector<16x32xf32> -> vector<16x32xf32>
    %174 = vector.broadcast %134 : vector<1x32xf32> to vector<16x32xf32>
    %175 = arith.addf %173, %174 : vector<16x32xf32>
    %176 = arith.addf %175, %127 : vector<16x32xf32>
    %177 = vector.extract_strided_slice %0 {offsets = [6, 0], sizes = [1, 32], strides = [1, 1]} : vector<18x32xf32> to vector<1x32xf32>
    %178 = vector.extract_strided_slice %0 {offsets = [7, 0], sizes = [1, 32], strides = [1, 1]} : vector<18x32xf32> to vector<1x32xf32>
    %cst_66 = arith.constant dense<0.000000e+00> : vector<16xf32>
    %179 = vector.multi_reduction <add>, %176, %cst_66 [1] : vector<16x32xf32> to vector<16xf32>
    %180 = vector.shape_cast %179 : vector<16xf32> to vector<16x1xf32>
    %cst_67 = arith.constant 3.200000e+01 : f32
    %181 = vector.broadcast %cst_67 : f32 to vector<16x1xf32>
    %182 = arith.divf %180, %181 : vector<16x1xf32>
    %183 = vector.broadcast %182 : vector<16x1xf32> to vector<16x32xf32>
    %184 = arith.subf %176, %183 : vector<16x32xf32>
    %185 = arith.mulf %184, %184 : vector<16x32xf32>
    %cst_68 = arith.constant dense<0.000000e+00> : vector<16xf32>
    %186 = vector.multi_reduction <add>, %185, %cst_68 [1] : vector<16x32xf32> to vector<16xf32>
    %187 = vector.shape_cast %186 : vector<16xf32> to vector<16x1xf32>
    %cst_69 = arith.constant 3.200000e+01 : f32
    %188 = vector.broadcast %cst_69 : f32 to vector<16x1xf32>
    %189 = arith.divf %187, %188 : vector<16x1xf32>
    %190 = vector.broadcast %182 : vector<16x1xf32> to vector<16x32xf32>
    %191 = arith.subf %176, %190 : vector<16x32xf32>
    %cst_70 = arith.constant 9.99999974E-6 : f32
    %192 = vector.broadcast %cst_70 : f32 to vector<16x1xf32>
    %193 = arith.addf %189, %192 : vector<16x1xf32>
    %194 = math.rsqrt %193 : vector<16x1xf32>
    %195 = vector.broadcast %194 : vector<16x1xf32> to vector<16x32xf32>
    %196 = arith.mulf %191, %195 : vector<16x32xf32>
    %197 = vector.broadcast %177 : vector<1x32xf32> to vector<16x32xf32>
    %198 = arith.mulf %196, %197 : vector<16x32xf32>
    %199 = vector.broadcast %178 : vector<1x32xf32> to vector<16x32xf32>
    %200 = arith.addf %198, %199 : vector<16x32xf32>
    %c0_71 = arith.constant 0 : index
    %c0_72 = arith.constant 0 : index
    %c0_73 = arith.constant 0 : index
    %201 = vector.load %arg10[%c0_71, %c0_72, %c0_73] : memref<2x32x48xf32, #tpu.memory_space<vmem>>, vector<1x32x48xf32>
    %202 = vector.shape_cast %201 : vector<1x32x48xf32> to vector<32x48xf32>
    %cst_74 = arith.constant dense<0.000000e+00> : vector<16x48xf32>
    %203 = tpu.matmul %200, %202, %cst_74 {dimension_numbers = #tpu.dot_dimension_numbers<[1], [0], [0], [1], [0, 0, 1, 1], [], []>} : vector<16x32xf32>, vector<32x48xf32>, vector<16x48xf32> -> vector<16x48xf32>
    %204 = vector.extract_strided_slice %203 {offsets = [0, 0], sizes = [16, 16], strides = [1, 1]} : vector<16x48xf32> to vector<16x16xf32>
    %205 = vector.extract_strided_slice %203 {offsets = [0, 16], sizes = [16, 16], strides = [1, 1]} : vector<16x48xf32> to vector<16x16xf32>
    %206 = vector.extract_strided_slice %203 {offsets = [0, 32], sizes = [16, 16], strides = [1, 1]} : vector<16x48xf32> to vector<16x16xf32>
    %207 = vector.extract_strided_slice %204 {offsets = [0, 0], sizes = [8, 16], strides = [1, 1]} : vector<16x16xf32> to vector<8x16xf32>
    %208 = vector.extract_strided_slice %205 {offsets = [0, 0], sizes = [8, 16], strides = [1, 1]} : vector<16x16xf32> to vector<8x16xf32>
    %209 = vector.extract_strided_slice %206 {offsets = [0, 0], sizes = [8, 16], strides = [1, 1]} : vector<16x16xf32> to vector<8x16xf32>
    %210 = vector.extract_strided_slice %207 {offsets = [0, 0], sizes = [8, 8], strides = [1, 1]} : vector<8x16xf32> to vector<8x8xf32>
    %211 = vector.extract_strided_slice %208 {offsets = [0, 0], sizes = [8, 8], strides = [1, 1]} : vector<8x16xf32> to vector<8x8xf32>
    %cst_75 = arith.constant dense<0.000000e+00> : vector<8x8xf32>
    %212 = tpu.matmul %210, %211, %cst_75 {dimension_numbers = #tpu.dot_dimension_numbers<[1], [1], [0], [0], [0, 0, 1, 0], [], []>} : vector<8x8xf32>, vector<8x8xf32>, vector<8x8xf32> -> vector<8x8xf32>
    %cst_76 = arith.constant dense<0xFF800000> : vector<8xf32>
    %213 = vector.multi_reduction <maximumf>, %212, %cst_76 [1] : vector<8x8xf32> to vector<8xf32>
    %214 = vector.shape_cast %213 : vector<8xf32> to vector<8x1xf32>
    %215 = vector.broadcast %214 : vector<8x1xf32> to vector<8x8xf32>
    %216 = arith.subf %212, %215 : vector<8x8xf32>
    %217 = math.exp %216 : vector<8x8xf32>
    %cst_77 = arith.constant dense<0.000000e+00> : vector<8xf32>
    %218 = vector.multi_reduction <add>, %217, %cst_77 [1] : vector<8x8xf32> to vector<8xf32>
    %219 = vector.shape_cast %218 : vector<8xf32> to vector<8x1xf32>
    %220 = vector.extract_strided_slice %209 {offsets = [0, 0], sizes = [8, 8], strides = [1, 1]} : vector<8x16xf32> to vector<8x8xf32>
    %cst_78 = arith.constant dense<0.000000e+00> : vector<8x8xf32>
    %221 = tpu.matmul %217, %220, %cst_78 {dimension_numbers = #tpu.dot_dimension_numbers<[1], [0], [0], [1], [0, 0, 1, 1], [], []>} : vector<8x8xf32>, vector<8x8xf32>, vector<8x8xf32> -> vector<8x8xf32>
    %222 = tpu.reciprocal %219 {approx = true} : vector<8x1xf32> -> vector<8x1xf32>
    %223 = vector.broadcast %222 : vector<8x1xf32> to vector<8x8xf32>
    %224 = arith.mulf %221, %223 : vector<8x8xf32>
    %225 = vector.extract_strided_slice %207 {offsets = [0, 8], sizes = [8, 8], strides = [1, 1]} : vector<8x16xf32> to vector<8x8xf32>
    %226 = vector.extract_strided_slice %208 {offsets = [0, 8], sizes = [8, 8], strides = [1, 1]} : vector<8x16xf32> to vector<8x8xf32>
    %cst_79 = arith.constant dense<0.000000e+00> : vector<8x8xf32>
    %227 = tpu.matmul %225, %226, %cst_79 {dimension_numbers = #tpu.dot_dimension_numbers<[1], [1], [0], [0], [0, 0, 1, 0], [], []>} : vector<8x8xf32>, vector<8x8xf32>, vector<8x8xf32> -> vector<8x8xf32>
    %cst_80 = arith.constant dense<0xFF800000> : vector<8xf32>
    %228 = vector.multi_reduction <maximumf>, %227, %cst_80 [1] : vector<8x8xf32> to vector<8xf32>
    %229 = vector.shape_cast %228 : vector<8xf32> to vector<8x1xf32>
    %230 = vector.broadcast %229 : vector<8x1xf32> to vector<8x8xf32>
    %231 = arith.subf %227, %230 : vector<8x8xf32>
    %232 = math.exp %231 : vector<8x8xf32>
    %cst_81 = arith.constant dense<0.000000e+00> : vector<8xf32>
    %233 = vector.multi_reduction <add>, %232, %cst_81 [1] : vector<8x8xf32> to vector<8xf32>
    %234 = vector.shape_cast %233 : vector<8xf32> to vector<8x1xf32>
    %235 = vector.extract_strided_slice %209 {offsets = [0, 8], sizes = [8, 8], strides = [1, 1]} : vector<8x16xf32> to vector<8x8xf32>
    %cst_82 = arith.constant dense<0.000000e+00> : vector<8x8xf32>
    %236 = tpu.matmul %232, %235, %cst_82 {dimension_numbers = #tpu.dot_dimension_numbers<[1], [0], [0], [1], [0, 0, 1, 1], [], []>} : vector<8x8xf32>, vector<8x8xf32>, vector<8x8xf32> -> vector<8x8xf32>
    %237 = tpu.reciprocal %234 {approx = true} : vector<8x1xf32> -> vector<8x1xf32>
    %238 = vector.broadcast %237 : vector<8x1xf32> to vector<8x8xf32>
    %239 = arith.mulf %236, %238 : vector<8x8xf32>
    %240 = tpu.concatenate %224, %239 in 1 : vector<8x8xf32>, vector<8x8xf32> -> vector<8x16xf32>
    %241 = vector.extract_strided_slice %204 {offsets = [8, 0], sizes = [8, 16], strides = [1, 1]} : vector<16x16xf32> to vector<8x16xf32>
    %242 = vector.extract_strided_slice %205 {offsets = [8, 0], sizes = [8, 16], strides = [1, 1]} : vector<16x16xf32> to vector<8x16xf32>
    %243 = vector.extract_strided_slice %206 {offsets = [8, 0], sizes = [8, 16], strides = [1, 1]} : vector<16x16xf32> to vector<8x16xf32>
    %244 = vector.extract_strided_slice %241 {offsets = [0, 0], sizes = [8, 8], strides = [1, 1]} : vector<8x16xf32> to vector<8x8xf32>
    %245 = vector.extract_strided_slice %242 {offsets = [0, 0], sizes = [8, 8], strides = [1, 1]} : vector<8x16xf32> to vector<8x8xf32>
    %cst_83 = arith.constant dense<0.000000e+00> : vector<8x8xf32>
    %246 = tpu.matmul %244, %245, %cst_83 {dimension_numbers = #tpu.dot_dimension_numbers<[1], [1], [0], [0], [0, 0, 1, 0], [], []>} : vector<8x8xf32>, vector<8x8xf32>, vector<8x8xf32> -> vector<8x8xf32>
    %cst_84 = arith.constant dense<0xFF800000> : vector<8xf32>
    %247 = vector.multi_reduction <maximumf>, %246, %cst_84 [1] : vector<8x8xf32> to vector<8xf32>
    %248 = vector.shape_cast %247 : vector<8xf32> to vector<8x1xf32>
    %249 = vector.broadcast %248 : vector<8x1xf32> to vector<8x8xf32>
    %250 = arith.subf %246, %249 : vector<8x8xf32>
    %251 = math.exp %250 : vector<8x8xf32>
    %cst_85 = arith.constant dense<0.000000e+00> : vector<8xf32>
    %252 = vector.multi_reduction <add>, %251, %cst_85 [1] : vector<8x8xf32> to vector<8xf32>
    %253 = vector.shape_cast %252 : vector<8xf32> to vector<8x1xf32>
    %254 = vector.extract_strided_slice %243 {offsets = [0, 0], sizes = [8, 8], strides = [1, 1]} : vector<8x16xf32> to vector<8x8xf32>
    %cst_86 = arith.constant dense<0.000000e+00> : vector<8x8xf32>
    %255 = tpu.matmul %251, %254, %cst_86 {dimension_numbers = #tpu.dot_dimension_numbers<[1], [0], [0], [1], [0, 0, 1, 1], [], []>} : vector<8x8xf32>, vector<8x8xf32>, vector<8x8xf32> -> vector<8x8xf32>
    %256 = tpu.reciprocal %253 {approx = true} : vector<8x1xf32> -> vector<8x1xf32>
    %257 = vector.broadcast %256 : vector<8x1xf32> to vector<8x8xf32>
    %258 = arith.mulf %255, %257 : vector<8x8xf32>
    %259 = vector.extract_strided_slice %241 {offsets = [0, 8], sizes = [8, 8], strides = [1, 1]} : vector<8x16xf32> to vector<8x8xf32>
    %260 = vector.extract_strided_slice %242 {offsets = [0, 8], sizes = [8, 8], strides = [1, 1]} : vector<8x16xf32> to vector<8x8xf32>
    %cst_87 = arith.constant dense<0.000000e+00> : vector<8x8xf32>
    %261 = tpu.matmul %259, %260, %cst_87 {dimension_numbers = #tpu.dot_dimension_numbers<[1], [1], [0], [0], [0, 0, 1, 0], [], []>} : vector<8x8xf32>, vector<8x8xf32>, vector<8x8xf32> -> vector<8x8xf32>
    %cst_88 = arith.constant dense<0xFF800000> : vector<8xf32>
    %262 = vector.multi_reduction <maximumf>, %261, %cst_88 [1] : vector<8x8xf32> to vector<8xf32>
    %263 = vector.shape_cast %262 : vector<8xf32> to vector<8x1xf32>
    %264 = vector.broadcast %263 : vector<8x1xf32> to vector<8x8xf32>
    %265 = arith.subf %261, %264 : vector<8x8xf32>
    %266 = math.exp %265 : vector<8x8xf32>
    %cst_89 = arith.constant dense<0.000000e+00> : vector<8xf32>
    %267 = vector.multi_reduction <add>, %266, %cst_89 [1] : vector<8x8xf32> to vector<8xf32>
    %268 = vector.shape_cast %267 : vector<8xf32> to vector<8x1xf32>
    %269 = vector.extract_strided_slice %243 {offsets = [0, 8], sizes = [8, 8], strides = [1, 1]} : vector<8x16xf32> to vector<8x8xf32>
    %cst_90 = arith.constant dense<0.000000e+00> : vector<8x8xf32>
    %270 = tpu.matmul %266, %269, %cst_90 {dimension_numbers = #tpu.dot_dimension_numbers<[1], [0], [0], [1], [0, 0, 1, 1], [], []>} : vector<8x8xf32>, vector<8x8xf32>, vector<8x8xf32> -> vector<8x8xf32>
    %271 = tpu.reciprocal %268 {approx = true} : vector<8x1xf32> -> vector<8x1xf32>
    %272 = vector.broadcast %271 : vector<8x1xf32> to vector<8x8xf32>
    %273 = arith.mulf %270, %272 : vector<8x8xf32>
    %274 = tpu.concatenate %258, %273 in 1 : vector<8x8xf32>, vector<8x8xf32> -> vector<8x16xf32>
    %275 = tpu.concatenate %240, %274 in 0 : vector<8x16xf32>, vector<8x16xf32> -> vector<16x16xf32>
    %c0_91 = arith.constant 0 : index
    %c0_92 = arith.constant 0 : index
    %c0_93 = arith.constant 0 : index
    %276 = vector.load %arg11[%c0_91, %c0_92, %c0_93] : memref<2x144x32xf32, #tpu.memory_space<vmem>>, vector<1x144x32xf32>
    %277 = vector.shape_cast %276 : vector<1x144x32xf32> to vector<144x32xf32>
    %278 = vector.extract_strided_slice %277 {offsets = [0, 0], sizes = [16, 32], strides = [1, 1]} : vector<144x32xf32> to vector<16x32xf32>
    %cst_94 = arith.constant dense<0.000000e+00> : vector<16x32xf32>
    %279 = tpu.matmul %275, %278, %cst_94 {dimension_numbers = #tpu.dot_dimension_numbers<[1], [0], [0], [1], [0, 0, 1, 1], [], []>} : vector<16x16xf32>, vector<16x32xf32>, vector<16x32xf32> -> vector<16x32xf32>
    %280 = vector.extract_strided_slice %0 {offsets = [8, 0], sizes = [1, 32], strides = [1, 1]} : vector<18x32xf32> to vector<1x32xf32>
    %281 = vector.broadcast %280 : vector<1x32xf32> to vector<16x32xf32>
    %282 = arith.addf %279, %281 : vector<16x32xf32>
    %283 = arith.addf %282, %176 : vector<16x32xf32>
    %284 = vector.extract_strided_slice %0 {offsets = [9, 0], sizes = [1, 32], strides = [1, 1]} : vector<18x32xf32> to vector<1x32xf32>
    %285 = vector.extract_strided_slice %0 {offsets = [10, 0], sizes = [1, 32], strides = [1, 1]} : vector<18x32xf32> to vector<1x32xf32>
    %c1_95 = arith.constant 1 : index
    %c0_96 = arith.constant 0 : index
    %c0_97 = arith.constant 0 : index
    %286 = vector.load %arg8[%c1_95, %c0_96, %c0_97] : memref<3x32x128xf32, #tpu.memory_space<vmem>>, vector<1x32x128xf32>
    %287 = vector.shape_cast %286 : vector<1x32x128xf32> to vector<32x128xf32>
    %288 = vector.extract_strided_slice %1 {offsets = [1, 0], sizes = [1, 128], strides = [1, 1]} : vector<3x128xf32> to vector<1x128xf32>
    %289 = vector.extract_strided_slice %277 {offsets = [16, 0], sizes = [128, 32], strides = [1, 1]} : vector<144x32xf32> to vector<128x32xf32>
    %290 = vector.extract_strided_slice %0 {offsets = [11, 0], sizes = [1, 32], strides = [1, 1]} : vector<18x32xf32> to vector<1x32xf32>
    %cst_98 = arith.constant dense<0.000000e+00> : vector<16xf32>
    %291 = vector.multi_reduction <add>, %283, %cst_98 [1] : vector<16x32xf32> to vector<16xf32>
    %292 = vector.shape_cast %291 : vector<16xf32> to vector<16x1xf32>
    %cst_99 = arith.constant 3.200000e+01 : f32
    %293 = vector.broadcast %cst_99 : f32 to vector<16x1xf32>
    %294 = arith.divf %292, %293 : vector<16x1xf32>
    %295 = vector.broadcast %294 : vector<16x1xf32> to vector<16x32xf32>
    %296 = arith.subf %283, %295 : vector<16x32xf32>
    %297 = arith.mulf %296, %296 : vector<16x32xf32>
    %cst_100 = arith.constant dense<0.000000e+00> : vector<16xf32>
    %298 = vector.multi_reduction <add>, %297, %cst_100 [1] : vector<16x32xf32> to vector<16xf32>
    %299 = vector.shape_cast %298 : vector<16xf32> to vector<16x1xf32>
    %cst_101 = arith.constant 3.200000e+01 : f32
    %300 = vector.broadcast %cst_101 : f32 to vector<16x1xf32>
    %301 = arith.divf %299, %300 : vector<16x1xf32>
    %302 = vector.broadcast %294 : vector<16x1xf32> to vector<16x32xf32>
    %303 = arith.subf %283, %302 : vector<16x32xf32>
    %cst_102 = arith.constant 9.99999974E-6 : f32
    %304 = vector.broadcast %cst_102 : f32 to vector<16x1xf32>
    %305 = arith.addf %301, %304 : vector<16x1xf32>
    %306 = math.rsqrt %305 : vector<16x1xf32>
    %307 = vector.broadcast %306 : vector<16x1xf32> to vector<16x32xf32>
    %308 = arith.mulf %303, %307 : vector<16x32xf32>
    %309 = vector.broadcast %284 : vector<1x32xf32> to vector<16x32xf32>
    %310 = arith.mulf %308, %309 : vector<16x32xf32>
    %311 = vector.broadcast %285 : vector<1x32xf32> to vector<16x32xf32>
    %312 = arith.addf %310, %311 : vector<16x32xf32>
    %cst_103 = arith.constant dense<0.000000e+00> : vector<16x128xf32>
    %313 = tpu.matmul %312, %287, %cst_103 {dimension_numbers = #tpu.dot_dimension_numbers<[1], [0], [0], [1], [0, 0, 1, 1], [], []>} : vector<16x32xf32>, vector<32x128xf32>, vector<16x128xf32> -> vector<16x128xf32>
    %314 = vector.broadcast %288 : vector<1x128xf32> to vector<16x128xf32>
    %315 = arith.addf %313, %314 : vector<16x128xf32>
    %316 = arith.mulf %315, %315 : vector<16x128xf32>
    %317 = arith.mulf %315, %316 : vector<16x128xf32>
    %cst_104 = arith.constant 4.471500e-02 : f32
    %318 = vector.broadcast %cst_104 : f32 to vector<16x128xf32>
    %319 = arith.mulf %318, %317 : vector<16x128xf32>
    %320 = arith.addf %315, %319 : vector<16x128xf32>
    %cst_105 = arith.constant 0.797884583 : f32
    %321 = vector.broadcast %cst_105 : f32 to vector<16x128xf32>
    %322 = arith.mulf %321, %320 : vector<16x128xf32>
    %323 = math.tanh %322 : vector<16x128xf32>
    %cst_106 = arith.constant 1.000000e+00 : f32
    %324 = vector.broadcast %cst_106 : f32 to vector<16x128xf32>
    %325 = arith.addf %324, %323 : vector<16x128xf32>
    %cst_107 = arith.constant 5.000000e-01 : f32
    %326 = vector.broadcast %cst_107 : f32 to vector<16x128xf32>
    %327 = arith.mulf %326, %325 : vector<16x128xf32>
    %328 = arith.mulf %315, %327 : vector<16x128xf32>
    %cst_108 = arith.constant dense<0.000000e+00> : vector<16x32xf32>
    %329 = tpu.matmul %328, %289, %cst_108 {dimension_numbers = #tpu.dot_dimension_numbers<[1], [0], [0], [1], [0, 0, 1, 1], [], []>} : vector<16x128xf32>, vector<128x32xf32>, vector<16x32xf32> -> vector<16x32xf32>
    %330 = vector.broadcast %290 : vector<1x32xf32> to vector<16x32xf32>
    %331 = arith.addf %329, %330 : vector<16x32xf32>
    %332 = arith.addf %331, %283 : vector<16x32xf32>
    %333 = vector.extract_strided_slice %0 {offsets = [12, 0], sizes = [1, 32], strides = [1, 1]} : vector<18x32xf32> to vector<1x32xf32>
    %334 = vector.extract_strided_slice %0 {offsets = [13, 0], sizes = [1, 32], strides = [1, 1]} : vector<18x32xf32> to vector<1x32xf32>
    %cst_109 = arith.constant dense<0.000000e+00> : vector<16xf32>
    %335 = vector.multi_reduction <add>, %332, %cst_109 [1] : vector<16x32xf32> to vector<16xf32>
    %336 = vector.shape_cast %335 : vector<16xf32> to vector<16x1xf32>
    %cst_110 = arith.constant 3.200000e+01 : f32
    %337 = vector.broadcast %cst_110 : f32 to vector<16x1xf32>
    %338 = arith.divf %336, %337 : vector<16x1xf32>
    %339 = vector.broadcast %338 : vector<16x1xf32> to vector<16x32xf32>
    %340 = arith.subf %332, %339 : vector<16x32xf32>
    %341 = arith.mulf %340, %340 : vector<16x32xf32>
    %cst_111 = arith.constant dense<0.000000e+00> : vector<16xf32>
    %342 = vector.multi_reduction <add>, %341, %cst_111 [1] : vector<16x32xf32> to vector<16xf32>
    %343 = vector.shape_cast %342 : vector<16xf32> to vector<16x1xf32>
    %cst_112 = arith.constant 3.200000e+01 : f32
    %344 = vector.broadcast %cst_112 : f32 to vector<16x1xf32>
    %345 = arith.divf %343, %344 : vector<16x1xf32>
    %346 = vector.broadcast %338 : vector<16x1xf32> to vector<16x32xf32>
    %347 = arith.subf %332, %346 : vector<16x32xf32>
    %cst_113 = arith.constant 9.99999974E-6 : f32
    %348 = vector.broadcast %cst_113 : f32 to vector<16x1xf32>
    %349 = arith.addf %345, %348 : vector<16x1xf32>
    %350 = math.rsqrt %349 : vector<16x1xf32>
    %351 = vector.broadcast %350 : vector<16x1xf32> to vector<16x32xf32>
    %352 = arith.mulf %347, %351 : vector<16x32xf32>
    %353 = vector.broadcast %333 : vector<1x32xf32> to vector<16x32xf32>
    %354 = arith.mulf %352, %353 : vector<16x32xf32>
    %355 = vector.broadcast %334 : vector<1x32xf32> to vector<16x32xf32>
    %356 = arith.addf %354, %355 : vector<16x32xf32>
    %c1_114 = arith.constant 1 : index
    %c0_115 = arith.constant 0 : index
    %c0_116 = arith.constant 0 : index
    %357 = vector.load %arg10[%c1_114, %c0_115, %c0_116] : memref<2x32x48xf32, #tpu.memory_space<vmem>>, vector<1x32x48xf32>
    %358 = vector.shape_cast %357 : vector<1x32x48xf32> to vector<32x48xf32>
    %cst_117 = arith.constant dense<0.000000e+00> : vector<16x48xf32>
    %359 = tpu.matmul %356, %358, %cst_117 {dimension_numbers = #tpu.dot_dimension_numbers<[1], [0], [0], [1], [0, 0, 1, 1], [], []>} : vector<16x32xf32>, vector<32x48xf32>, vector<16x48xf32> -> vector<16x48xf32>
    %360 = vector.extract_strided_slice %359 {offsets = [0, 0], sizes = [16, 16], strides = [1, 1]} : vector<16x48xf32> to vector<16x16xf32>
    %361 = vector.extract_strided_slice %359 {offsets = [0, 16], sizes = [16, 16], strides = [1, 1]} : vector<16x48xf32> to vector<16x16xf32>
    %362 = vector.extract_strided_slice %359 {offsets = [0, 32], sizes = [16, 16], strides = [1, 1]} : vector<16x48xf32> to vector<16x16xf32>
    %363 = vector.extract_strided_slice %360 {offsets = [0, 0], sizes = [8, 16], strides = [1, 1]} : vector<16x16xf32> to vector<8x16xf32>
    %364 = vector.extract_strided_slice %361 {offsets = [0, 0], sizes = [8, 16], strides = [1, 1]} : vector<16x16xf32> to vector<8x16xf32>
    %365 = vector.extract_strided_slice %362 {offsets = [0, 0], sizes = [8, 16], strides = [1, 1]} : vector<16x16xf32> to vector<8x16xf32>
    %366 = vector.extract_strided_slice %363 {offsets = [0, 0], sizes = [8, 8], strides = [1, 1]} : vector<8x16xf32> to vector<8x8xf32>
    %367 = vector.extract_strided_slice %364 {offsets = [0, 0], sizes = [8, 8], strides = [1, 1]} : vector<8x16xf32> to vector<8x8xf32>
    %cst_118 = arith.constant dense<0.000000e+00> : vector<8x8xf32>
    %368 = tpu.matmul %366, %367, %cst_118 {dimension_numbers = #tpu.dot_dimension_numbers<[1], [1], [0], [0], [0, 0, 1, 0], [], []>} : vector<8x8xf32>, vector<8x8xf32>, vector<8x8xf32> -> vector<8x8xf32>
    %cst_119 = arith.constant dense<0xFF800000> : vector<8xf32>
    %369 = vector.multi_reduction <maximumf>, %368, %cst_119 [1] : vector<8x8xf32> to vector<8xf32>
    %370 = vector.shape_cast %369 : vector<8xf32> to vector<8x1xf32>
    %371 = vector.broadcast %370 : vector<8x1xf32> to vector<8x8xf32>
    %372 = arith.subf %368, %371 : vector<8x8xf32>
    %373 = math.exp %372 : vector<8x8xf32>
    %cst_120 = arith.constant dense<0.000000e+00> : vector<8xf32>
    %374 = vector.multi_reduction <add>, %373, %cst_120 [1] : vector<8x8xf32> to vector<8xf32>
    %375 = vector.shape_cast %374 : vector<8xf32> to vector<8x1xf32>
    %376 = vector.extract_strided_slice %365 {offsets = [0, 0], sizes = [8, 8], strides = [1, 1]} : vector<8x16xf32> to vector<8x8xf32>
    %cst_121 = arith.constant dense<0.000000e+00> : vector<8x8xf32>
    %377 = tpu.matmul %373, %376, %cst_121 {dimension_numbers = #tpu.dot_dimension_numbers<[1], [0], [0], [1], [0, 0, 1, 1], [], []>} : vector<8x8xf32>, vector<8x8xf32>, vector<8x8xf32> -> vector<8x8xf32>
    %378 = tpu.reciprocal %375 {approx = true} : vector<8x1xf32> -> vector<8x1xf32>
    %379 = vector.broadcast %378 : vector<8x1xf32> to vector<8x8xf32>
    %380 = arith.mulf %377, %379 : vector<8x8xf32>
    %381 = vector.extract_strided_slice %363 {offsets = [0, 8], sizes = [8, 8], strides = [1, 1]} : vector<8x16xf32> to vector<8x8xf32>
    %382 = vector.extract_strided_slice %364 {offsets = [0, 8], sizes = [8, 8], strides = [1, 1]} : vector<8x16xf32> to vector<8x8xf32>
    %cst_122 = arith.constant dense<0.000000e+00> : vector<8x8xf32>
    %383 = tpu.matmul %381, %382, %cst_122 {dimension_numbers = #tpu.dot_dimension_numbers<[1], [1], [0], [0], [0, 0, 1, 0], [], []>} : vector<8x8xf32>, vector<8x8xf32>, vector<8x8xf32> -> vector<8x8xf32>
    %cst_123 = arith.constant dense<0xFF800000> : vector<8xf32>
    %384 = vector.multi_reduction <maximumf>, %383, %cst_123 [1] : vector<8x8xf32> to vector<8xf32>
    %385 = vector.shape_cast %384 : vector<8xf32> to vector<8x1xf32>
    %386 = vector.broadcast %385 : vector<8x1xf32> to vector<8x8xf32>
    %387 = arith.subf %383, %386 : vector<8x8xf32>
    %388 = math.exp %387 : vector<8x8xf32>
    %cst_124 = arith.constant dense<0.000000e+00> : vector<8xf32>
    %389 = vector.multi_reduction <add>, %388, %cst_124 [1] : vector<8x8xf32> to vector<8xf32>
    %390 = vector.shape_cast %389 : vector<8xf32> to vector<8x1xf32>
    %391 = vector.extract_strided_slice %365 {offsets = [0, 8], sizes = [8, 8], strides = [1, 1]} : vector<8x16xf32> to vector<8x8xf32>
    %cst_125 = arith.constant dense<0.000000e+00> : vector<8x8xf32>
    %392 = tpu.matmul %388, %391, %cst_125 {dimension_numbers = #tpu.dot_dimension_numbers<[1], [0], [0], [1], [0, 0, 1, 1], [], []>} : vector<8x8xf32>, vector<8x8xf32>, vector<8x8xf32> -> vector<8x8xf32>
    %393 = tpu.reciprocal %390 {approx = true} : vector<8x1xf32> -> vector<8x1xf32>
    %394 = vector.broadcast %393 : vector<8x1xf32> to vector<8x8xf32>
    %395 = arith.mulf %392, %394 : vector<8x8xf32>
    %396 = tpu.concatenate %380, %395 in 1 : vector<8x8xf32>, vector<8x8xf32> -> vector<8x16xf32>
    %397 = vector.extract_strided_slice %360 {offsets = [8, 0], sizes = [8, 16], strides = [1, 1]} : vector<16x16xf32> to vector<8x16xf32>
    %398 = vector.extract_strided_slice %361 {offsets = [8, 0], sizes = [8, 16], strides = [1, 1]} : vector<16x16xf32> to vector<8x16xf32>
    %399 = vector.extract_strided_slice %362 {offsets = [8, 0], sizes = [8, 16], strides = [1, 1]} : vector<16x16xf32> to vector<8x16xf32>
    %400 = vector.extract_strided_slice %397 {offsets = [0, 0], sizes = [8, 8], strides = [1, 1]} : vector<8x16xf32> to vector<8x8xf32>
    %401 = vector.extract_strided_slice %398 {offsets = [0, 0], sizes = [8, 8], strides = [1, 1]} : vector<8x16xf32> to vector<8x8xf32>
    %cst_126 = arith.constant dense<0.000000e+00> : vector<8x8xf32>
    %402 = tpu.matmul %400, %401, %cst_126 {dimension_numbers = #tpu.dot_dimension_numbers<[1], [1], [0], [0], [0, 0, 1, 0], [], []>} : vector<8x8xf32>, vector<8x8xf32>, vector<8x8xf32> -> vector<8x8xf32>
    %cst_127 = arith.constant dense<0xFF800000> : vector<8xf32>
    %403 = vector.multi_reduction <maximumf>, %402, %cst_127 [1] : vector<8x8xf32> to vector<8xf32>
    %404 = vector.shape_cast %403 : vector<8xf32> to vector<8x1xf32>
    %405 = vector.broadcast %404 : vector<8x1xf32> to vector<8x8xf32>
    %406 = arith.subf %402, %405 : vector<8x8xf32>
    %407 = math.exp %406 : vector<8x8xf32>
    %cst_128 = arith.constant dense<0.000000e+00> : vector<8xf32>
    %408 = vector.multi_reduction <add>, %407, %cst_128 [1] : vector<8x8xf32> to vector<8xf32>
    %409 = vector.shape_cast %408 : vector<8xf32> to vector<8x1xf32>
    %410 = vector.extract_strided_slice %399 {offsets = [0, 0], sizes = [8, 8], strides = [1, 1]} : vector<8x16xf32> to vector<8x8xf32>
    %cst_129 = arith.constant dense<0.000000e+00> : vector<8x8xf32>
    %411 = tpu.matmul %407, %410, %cst_129 {dimension_numbers = #tpu.dot_dimension_numbers<[1], [0], [0], [1], [0, 0, 1, 1], [], []>} : vector<8x8xf32>, vector<8x8xf32>, vector<8x8xf32> -> vector<8x8xf32>
    %412 = tpu.reciprocal %409 {approx = true} : vector<8x1xf32> -> vector<8x1xf32>
    %413 = vector.broadcast %412 : vector<8x1xf32> to vector<8x8xf32>
    %414 = arith.mulf %411, %413 : vector<8x8xf32>
    %415 = vector.extract_strided_slice %397 {offsets = [0, 8], sizes = [8, 8], strides = [1, 1]} : vector<8x16xf32> to vector<8x8xf32>
    %416 = vector.extract_strided_slice %398 {offsets = [0, 8], sizes = [8, 8], strides = [1, 1]} : vector<8x16xf32> to vector<8x8xf32>
    %cst_130 = arith.constant dense<0.000000e+00> : vector<8x8xf32>
    %417 = tpu.matmul %415, %416, %cst_130 {dimension_numbers = #tpu.dot_dimension_numbers<[1], [1], [0], [0], [0, 0, 1, 0], [], []>} : vector<8x8xf32>, vector<8x8xf32>, vector<8x8xf32> -> vector<8x8xf32>
    %cst_131 = arith.constant dense<0xFF800000> : vector<8xf32>
    %418 = vector.multi_reduction <maximumf>, %417, %cst_131 [1] : vector<8x8xf32> to vector<8xf32>
    %419 = vector.shape_cast %418 : vector<8xf32> to vector<8x1xf32>
    %420 = vector.broadcast %419 : vector<8x1xf32> to vector<8x8xf32>
    %421 = arith.subf %417, %420 : vector<8x8xf32>
    %422 = math.exp %421 : vector<8x8xf32>
    %cst_132 = arith.constant dense<0.000000e+00> : vector<8xf32>
    %423 = vector.multi_reduction <add>, %422, %cst_132 [1] : vector<8x8xf32> to vector<8xf32>
    %424 = vector.shape_cast %423 : vector<8xf32> to vector<8x1xf32>
    %425 = vector.extract_strided_slice %399 {offsets = [0, 8], sizes = [8, 8], strides = [1, 1]} : vector<8x16xf32> to vector<8x8xf32>
    %cst_133 = arith.constant dense<0.000000e+00> : vector<8x8xf32>
    %426 = tpu.matmul %422, %425, %cst_133 {dimension_numbers = #tpu.dot_dimension_numbers<[1], [0], [0], [1], [0, 0, 1, 1], [], []>} : vector<8x8xf32>, vector<8x8xf32>, vector<8x8xf32> -> vector<8x8xf32>
    %427 = tpu.reciprocal %424 {approx = true} : vector<8x1xf32> -> vector<8x1xf32>
    %428 = vector.broadcast %427 : vector<8x1xf32> to vector<8x8xf32>
    %429 = arith.mulf %426, %428 : vector<8x8xf32>
    %430 = tpu.concatenate %414, %429 in 1 : vector<8x8xf32>, vector<8x8xf32> -> vector<8x16xf32>
    %431 = tpu.concatenate %396, %430 in 0 : vector<8x16xf32>, vector<8x16xf32> -> vector<16x16xf32>
    %c1_134 = arith.constant 1 : index
    %c0_135 = arith.constant 0 : index
    %c0_136 = arith.constant 0 : index
    %432 = vector.load %arg11[%c1_134, %c0_135, %c0_136] : memref<2x144x32xf32, #tpu.memory_space<vmem>>, vector<1x144x32xf32>
    %433 = vector.shape_cast %432 : vector<1x144x32xf32> to vector<144x32xf32>
    %434 = vector.extract_strided_slice %433 {offsets = [0, 0], sizes = [16, 32], strides = [1, 1]} : vector<144x32xf32> to vector<16x32xf32>
    %cst_137 = arith.constant dense<0.000000e+00> : vector<16x32xf32>
    %435 = tpu.matmul %431, %434, %cst_137 {dimension_numbers = #tpu.dot_dimension_numbers<[1], [0], [0], [1], [0, 0, 1, 1], [], []>} : vector<16x16xf32>, vector<16x32xf32>, vector<16x32xf32> -> vector<16x32xf32>
    %436 = vector.extract_strided_slice %0 {offsets = [14, 0], sizes = [1, 32], strides = [1, 1]} : vector<18x32xf32> to vector<1x32xf32>
    %437 = vector.broadcast %436 : vector<1x32xf32> to vector<16x32xf32>
    %438 = arith.addf %435, %437 : vector<16x32xf32>
    %439 = arith.addf %438, %332 : vector<16x32xf32>
    %440 = vector.extract_strided_slice %0 {offsets = [15, 0], sizes = [1, 32], strides = [1, 1]} : vector<18x32xf32> to vector<1x32xf32>
    %441 = vector.extract_strided_slice %0 {offsets = [16, 0], sizes = [1, 32], strides = [1, 1]} : vector<18x32xf32> to vector<1x32xf32>
    %c2 = arith.constant 2 : index
    %c0_138 = arith.constant 0 : index
    %c0_139 = arith.constant 0 : index
    %442 = vector.load %arg8[%c2, %c0_138, %c0_139] : memref<3x32x128xf32, #tpu.memory_space<vmem>>, vector<1x32x128xf32>
    %443 = vector.shape_cast %442 : vector<1x32x128xf32> to vector<32x128xf32>
    %444 = vector.extract_strided_slice %1 {offsets = [2, 0], sizes = [1, 128], strides = [1, 1]} : vector<3x128xf32> to vector<1x128xf32>
    %445 = vector.extract_strided_slice %433 {offsets = [16, 0], sizes = [128, 32], strides = [1, 1]} : vector<144x32xf32> to vector<128x32xf32>
    %446 = vector.extract_strided_slice %0 {offsets = [17, 0], sizes = [1, 32], strides = [1, 1]} : vector<18x32xf32> to vector<1x32xf32>
    %cst_140 = arith.constant dense<0.000000e+00> : vector<16xf32>
    %447 = vector.multi_reduction <add>, %439, %cst_140 [1] : vector<16x32xf32> to vector<16xf32>
    %448 = vector.shape_cast %447 : vector<16xf32> to vector<16x1xf32>
    %cst_141 = arith.constant 3.200000e+01 : f32
    %449 = vector.broadcast %cst_141 : f32 to vector<16x1xf32>
    %450 = arith.divf %448, %449 : vector<16x1xf32>
    %451 = vector.broadcast %450 : vector<16x1xf32> to vector<16x32xf32>
    %452 = arith.subf %439, %451 : vector<16x32xf32>
    %453 = arith.mulf %452, %452 : vector<16x32xf32>
    %cst_142 = arith.constant dense<0.000000e+00> : vector<16xf32>
    %454 = vector.multi_reduction <add>, %453, %cst_142 [1] : vector<16x32xf32> to vector<16xf32>
    %455 = vector.shape_cast %454 : vector<16xf32> to vector<16x1xf32>
    %cst_143 = arith.constant 3.200000e+01 : f32
    %456 = vector.broadcast %cst_143 : f32 to vector<16x1xf32>
    %457 = arith.divf %455, %456 : vector<16x1xf32>
    %458 = vector.broadcast %450 : vector<16x1xf32> to vector<16x32xf32>
    %459 = arith.subf %439, %458 : vector<16x32xf32>
    %cst_144 = arith.constant 9.99999974E-6 : f32
    %460 = vector.broadcast %cst_144 : f32 to vector<16x1xf32>
    %461 = arith.addf %457, %460 : vector<16x1xf32>
    %462 = math.rsqrt %461 : vector<16x1xf32>
    %463 = vector.broadcast %462 : vector<16x1xf32> to vector<16x32xf32>
    %464 = arith.mulf %459, %463 : vector<16x32xf32>
    %465 = vector.broadcast %440 : vector<1x32xf32> to vector<16x32xf32>
    %466 = arith.mulf %464, %465 : vector<16x32xf32>
    %467 = vector.broadcast %441 : vector<1x32xf32> to vector<16x32xf32>
    %468 = arith.addf %466, %467 : vector<16x32xf32>
    %cst_145 = arith.constant dense<0.000000e+00> : vector<16x128xf32>
    %469 = tpu.matmul %468, %443, %cst_145 {dimension_numbers = #tpu.dot_dimension_numbers<[1], [0], [0], [1], [0, 0, 1, 1], [], []>} : vector<16x32xf32>, vector<32x128xf32>, vector<16x128xf32> -> vector<16x128xf32>
    %470 = vector.broadcast %444 : vector<1x128xf32> to vector<16x128xf32>
    %471 = arith.addf %469, %470 : vector<16x128xf32>
    %472 = arith.mulf %471, %471 : vector<16x128xf32>
    %473 = arith.mulf %471, %472 : vector<16x128xf32>
    %cst_146 = arith.constant 4.471500e-02 : f32
    %474 = vector.broadcast %cst_146 : f32 to vector<16x128xf32>
    %475 = arith.mulf %474, %473 : vector<16x128xf32>
    %476 = arith.addf %471, %475 : vector<16x128xf32>
    %cst_147 = arith.constant 0.797884583 : f32
    %477 = vector.broadcast %cst_147 : f32 to vector<16x128xf32>
    %478 = arith.mulf %477, %476 : vector<16x128xf32>
    %479 = math.tanh %478 : vector<16x128xf32>
    %cst_148 = arith.constant 1.000000e+00 : f32
    %480 = vector.broadcast %cst_148 : f32 to vector<16x128xf32>
    %481 = arith.addf %480, %479 : vector<16x128xf32>
    %cst_149 = arith.constant 5.000000e-01 : f32
    %482 = vector.broadcast %cst_149 : f32 to vector<16x128xf32>
    %483 = arith.mulf %482, %481 : vector<16x128xf32>
    %484 = arith.mulf %471, %483 : vector<16x128xf32>
    %cst_150 = arith.constant dense<0.000000e+00> : vector<16x32xf32>
    %485 = tpu.matmul %484, %445, %cst_150 {dimension_numbers = #tpu.dot_dimension_numbers<[1], [0], [0], [1], [0, 0, 1, 1], [], []>} : vector<16x128xf32>, vector<128x32xf32>, vector<16x32xf32> -> vector<16x32xf32>
    %486 = vector.broadcast %446 : vector<1x32xf32> to vector<16x32xf32>
    %487 = arith.addf %485, %486 : vector<16x32xf32>
    %488 = arith.addf %487, %439 : vector<16x32xf32>
    %489 = vector.extract_strided_slice %488 {offsets = [0, 0], sizes = [8, 32], strides = [1, 1]} : vector<16x32xf32> to vector<8x32xf32>
    %cst_151 = arith.constant dense<0.000000e+00> : vector<32xf32>
    %490 = vector.multi_reduction <add>, %489, %cst_151 [0] : vector<8x32xf32> to vector<32xf32>
    %491 = vector.shape_cast %490 : vector<32xf32> to vector<1x32xf32>
    %cst_152 = arith.constant 8.000000e+00 : f32
    %492 = vector.broadcast %cst_152 : f32 to vector<1x32xf32>
    %493 = arith.divf %491, %492 : vector<1x32xf32>
    %494 = vector.extract_strided_slice %488 {offsets = [8, 0], sizes = [8, 32], strides = [1, 1]} : vector<16x32xf32> to vector<8x32xf32>
    %cst_153 = arith.constant dense<0.000000e+00> : vector<32xf32>
    %495 = vector.multi_reduction <add>, %494, %cst_153 [0] : vector<8x32xf32> to vector<32xf32>
    %496 = vector.shape_cast %495 : vector<32xf32> to vector<1x32xf32>
    %cst_154 = arith.constant 8.000000e+00 : f32
    %497 = vector.broadcast %cst_154 : f32 to vector<1x32xf32>
    %498 = arith.divf %496, %497 : vector<1x32xf32>
    %499 = tpu.concatenate %493, %498 in 0 : vector<1x32xf32>, vector<1x32xf32> -> vector<2x32xf32>
    %c0_155 = arith.constant 0 : index
    %c0_156 = arith.constant 0 : index
    %500 = vector.load %arg12[%c0_155, %c0_156] : memref<2x32xf32, #tpu.memory_space<vmem>>, vector<2x32xf32>
    tpu.vector_store %arg12[%c0_155, %c0_156], %499 {strides = array<i32>} : memref<2x32xf32, #tpu.memory_space<vmem>>, vector<2x32xf32>,
    return
  }
  func.func @transform_0(%arg0: i32) -> (i32, i32, i32) {
    %c0_i32 = arith.constant 0 : i32
    %c0_i32_0 = arith.constant 0 : i32
    %c0_i32_1 = arith.constant 0 : i32
    %c0_i32_2 = arith.constant 0 : i32
    return %c0_i32, %c0_i32_0, %c0_i32_1 : i32, i32, i32
  }
  func.func @transform_1(%arg0: i32) -> (i32, i32) {
    %c0_i32 = arith.constant 0 : i32
    %c0_i32_0 = arith.constant 0 : i32
    %c0_i32_1 = arith.constant 0 : i32
    return %c0_i32, %c0_i32_0 : i32, i32
  }
  func.func @transform_2(%arg0: i32) -> (i32, i32) {
    %c0_i32 = arith.constant 0 : i32
    %c0_i32_0 = arith.constant 0 : i32
    %c0_i32_1 = arith.constant 0 : i32
    return %c0_i32, %c0_i32_0 : i32, i32
  }
  func.func @transform_3(%arg0: i32) -> (i32, i32) {
    %c0_i32 = arith.constant 0 : i32
    %c0_i32_0 = arith.constant 0 : i32
    %c0_i32_1 = arith.constant 0 : i32
    return %c0_i32, %c0_i32_0 : i32, i32
  }
  func.func @transform_4(%arg0: i32) -> (i32, i32, i32) {
    %c0_i32 = arith.constant 0 : i32
    %c0_i32_0 = arith.constant 0 : i32
    %c0_i32_1 = arith.constant 0 : i32
    %c0_i32_2 = arith.constant 0 : i32
    return %c0_i32, %c0_i32_0, %c0_i32_1 : i32, i32, i32
  }
  func.func @transform_5(%arg0: i32) -> (i32, i32, i32) {
    %c0_i32 = arith.constant 0 : i32
    %c0_i32_0 = arith.constant 0 : i32
    %c0_i32_1 = arith.constant 0 : i32
    %c0_i32_2 = arith.constant 0 : i32
    return %c0_i32, %c0_i32_0, %c0_i32_1 : i32, i32, i32
  }
  func.func @transform_6(%arg0: i32) -> (i32, i32, i32) {
    %c0_i32 = arith.constant 0 : i32
    %c0_i32_0 = arith.constant 0 : i32
    %c0_i32_1 = arith.constant 0 : i32
    %c0_i32_2 = arith.constant 0 : i32
    return %c0_i32, %c0_i32_0, %c0_i32_1 : i32, i32, i32
  }
  func.func @transform_7(%arg0: i32) -> (i32, i32, i32) {
    %c0_i32 = arith.constant 0 : i32
    %c0_i32_0 = arith.constant 0 : i32
    %c0_i32_1 = arith.constant 0 : i32
    %c0_i32_2 = arith.constant 0 : i32
    return %c0_i32, %c0_i32_0, %c0_i32_1 : i32, i32, i32
  }
  func.func @transform_8(%arg0: i32) -> (i32, i32, i32) {
    %c0_i32 = arith.constant 0 : i32
    %c0_i32_0 = arith.constant 0 : i32
    %c0_i32_1 = arith.constant 0 : i32
    %c0_i32_2 = arith.constant 0 : i32
    return %c0_i32, %c0_i32_0, %c0_i32_1 : i32, i32, i32
  }
  func.func @transform_9(%arg0: i32) -> (i32, i32, i32) {
    %c0_i32 = arith.constant 0 : i32
    %c0_i32_0 = arith.constant 0 : i32
    %c0_i32_1 = arith.constant 0 : i32
    %c0_i32_2 = arith.constant 0 : i32
    return %c0_i32, %c0_i32_0, %c0_i32_1 : i32, i32, i32
  }
  func.func @transform_10(%arg0: i32) -> (i32, i32, i32) {
    %c0_i32 = arith.constant 0 : i32
    %c0_i32_0 = arith.constant 0 : i32
    %c0_i32_1 = arith.constant 0 : i32
    %c0_i32_2 = arith.constant 0 : i32
    return %c0_i32, %c0_i32_0, %c0_i32_1 : i32, i32, i32
  }
  func.func @transform_11(%arg0: i32) -> (i32, i32) {
    %c0_i32 = arith.constant 0 : i32
    %c0_i32_0 = arith.constant 0 : i32
    %c0_i32_1 = arith.constant 0 : i32
    return %c0_i32, %c0_i32_0 : i32, i32
  }
}

</mosaic_0001>

<bundles_post_ra>
// kernel: vision_perceiver_forward.1
= control target key start
LH: loop header
LB: loop body
LE: loop exit
PB: predicated region body
PF: predicated region fallthrough
CT: control target
= control target key end

     0   :  { %vm51_vm0 = vcmask 220160   ;;  %vm153_vm1 = vcmask 261120   ;;  %s2657_s0 = inlined_call_operand.vmem [shape: f32[2,16,27], index: 0, kind: input, shape index: {}]   ;;  %s2658_s1 = inlined_call_operand.vmem [shape: f32[16,32], index: 1, kind: input, shape index: {}]   ;;  %s2659_s2 = inlined_call_operand.vmem [shape: f32[18,32], index: 2, kind: input, shape index: {}]   ;;  %s2660_s3 = inlined_call_operand.vmem [shape: f32[3,128], index: 3, kind: input, shape index: {}]   ;;  %s2661_s4 = inlined_call_operand.vmem [shape: f32[1,32,27], index: 4, kind: input, shape index: {}]   ;;  %s2662_s5 = inlined_call_operand.vmem [shape: f32[1,32,8], index: 5, kind: input, shape index: {}]   ;;  %s2663_s6 = inlined_call_operand.vmem [shape: f32[1,27,16], index: 6, kind: input, shape index: {}]   ;;  %s2664_s7 = inlined_call_operand.vmem [shape: f32[3,32,128], index: 7, kind: input, shape index: {}]   ;;  %s2665_s8 = inlined_call_operand.vmem [shape: f32[1,136,32], index: 8, kind: input, shape index: {}]   ;;  %s2666_s9 = inlined_call_operand.vmem [shape: f32[2,32,48], index: 9, kind: input, shape index: {}]   ;;  %s2667_s10 = inlined_call_operand.vmem [shape: f32[2,144,32], index: 10, kind: input, shape index: {}]   ;;  %s2668_s11 = inlined_call_operand.hbm [shape: f32[2,32], index: 11, kind: output, shape index: {}]  }
   0x1   :  { %v49_v0 = vld [vmem:[%s2657_s0] sm:$0xff] }
   0x2   :  { %v52_v1 = vsel %vm51_vm0, %v49_v0, 0.0  ;;  %v2041_v2 = vld [vmem:[%s2658_s1] sm:$0xff] }
   0x3   :  { %16 = vsyncpa [#allocation3], 0  ;;  %53 = vadd.xlane.f32.xlu0 %v52_v1  ;;  %v154_v3 = vsel %vm153_vm1, %v2041_v2, 0.0  ;;  %v50_v4 = vld [vmem:[%s2657_s0 + $0x8] sm:$0xff]  ;;  %v1965_v8 = vmov 32.0   ;;  %v2084_v40 = vld [vmem:[%s2657_s0 + $0x10] sm:$0xff] }
   0x4   :  { %155 = vadd.xlane.f32.xlu1 %v154_v3  ;;  %v55_v5 = vsel %vm51_vm0, %v50_v4, 0.0  ;;  %v2052_v6 = vld [vmem:[%s2658_s1 + $0x8] sm:$0xff]  ;;  %1854 = vrcp.f32 %v1965_v8  ;;  %v104_v42 = vsel %vm51_vm0, %v2084_v40, 0.0  ;;  %v2092_v43 = vld [vmem:[%s2657_s0 + $0x18] sm:$0xff]  ;;  %v213_v49 = vld [vmem:[%s2662_s5 + $0x10] sm:$0xff]  ;;  %vm260_vm3 = vcmask 1042432  }
   0x5   :  { %v157_v7 = vsel %vm153_vm1, %v2052_v6, 0.0  ;;  %v107_v44 = vsel %vm51_vm0, %v2092_v43, 0.0  ;;  %v214_v47 = vld [vmem:[%s2662_s5 + $0x18] sm:$0xff]  ;;  %v212_v52 = vld [vmem:[%s2662_s5 + $0x8] sm:$0xff]  ;;  %v211_v55 = vld [vmem:[%s2662_s5] sm:$0xff]  ;;  %s1966_s18 = smov 120  }
   0x6   :  { %233 = vmatpush.msra.mxu3 %v214_v47  ;;  %v247_v53 = vld [vmem:[%s2663_s6 + $0x18] sm:$0x7]  ;;  %v2120_v58 = vld [vmem:[%s2663_s6 + $0x10] sm:$0xff]  ;;  %v2126_v59 = vld [vmem:[%s2663_s6 + $0x8] sm:$0xff]  ;;  %vm338_vm13 = vcmask 64512   ;;  %s1967_s16 = smov 104  }
   0x7   :  { %1752 = vmatpush.msk.msra.mxu1 %vm260_vm3, %v247_v53  ;;  %v2131_v61 = vld [vmem:[%s2663_s6] sm:$0xff]  ;;  %s1968_s17 = smov 112   ;;  %s1969_s19 = smov 88  }
   0x8   :  { %234 = vmatpush.msra.mxu3 %v213_v49  ;;  %s1970_s20 = smov 96   ;;  %s1971_s21 = smov 8  }
   0x9   :  { %277 = vmatpush.msra.mxu1 %v2120_v58  ;;  %s1739_s29 = sshll.u32 %s2668_s11, 4  ;;  %s1740_s29 = int_to_ptr.hbm [resolvable:$true] %s1739_s29 }
   0xa   :  { %v1855_v9 = vpop.eup %1854  ;;  %235 = vmatpush.msra.mxu3 %v212_v52 }
   0xb   :  { %56 = vadd.xlane.f32.xlu0 %v55_v5  ;;  %v161_v10 = vmul.f32 32.0, %v1855_v9  ;;  %vm165_vm2 = vweird.f32 %v1855_v9  ;;  %278 = vmatpush.msra.mxu1 %v2126_v59 }
   0xc   :  { %236 = vmatpush.msra.mxu3 %v211_v55 }
   0xd   :  { %v162_v12 = vsub.f32 1.0, %v161_v10  ;;  %279 = vmatpush.msra.mxu1 %v2131_v61 }
   0xf   :  { %v163_v13 = vmul.f32 %v1855_v9, %v162_v12 }
  0x11   :  { %v164_v16 = vadd.f32 %v1855_v9, %v163_v13 }
  0x13   :  { %158 = vadd.xlane.f32.xlu0 %v157_v7  ;;  %v2056_v19 = vsel %vm165_vm2, %v1855_v9, %v164_v16 }
  0x76   :  { %v54_v11 = vpop.xlane.xlu0 %53 }
  0x77   :  { %v156_v26 = vpop.xlane.xlu1 %155 }
  0x78   :  { %v167_v30 = vmul.f32 %v2056_v19, %v156_v26 }
  0x7a   :  { %v2075_v36 = vsub.f32 %v2041_v2, %v167_v30 }
  0x7c   :  { %v171_v39 = vmul.f32 %v2075_v36, %v2075_v36 }
  0x7e   :  { %v57_v14 = vpop.xlane.xlu0 %56  ;;  %v173_v41 = vsel %vm153_vm1, %v171_v39, 0.0 }
  0x7f   :  { %v58_v15 = vadd.f32 %v57_v14, %v54_v11 }
  0x81   :  { %v59_v17 = vrot.slane %v58_v15, 4 }
  0x83   :  { %v60_v18 = vadd.f32 %v59_v17, %v58_v15 }
  0x85   :  { %v61_v20 = vrot.slane %v60_v18, 2 }
  0x86   :  { %v159_v21 = vpop.xlane.xlu0 %158 }
  0x87   :  { %v62_v22 = vadd.f32 %v61_v20, %v60_v18  ;;  %v168_v23 = vmul.f32 %v2056_v19, %v159_v21 }
  0x89   :  { %v63_v24 = vrot.slane %v62_v22, 1  ;;  %v2060_v25 = vsub.f32 %v2052_v6, %v168_v23 }
  0x8b   :  { %v64_v27 = vadd.f32 %v63_v24, %v62_v22  ;;  %v172_v28 = vmul.f32 %v2060_v25, %v2060_v25 }
  0x8d   :  { %v65_v29 = vmul.f32 0.0023148148, %v64_v27  ;;  %v176_v31 = vsel %vm153_vm1, %v172_v28, 0.0 }
  0x8e   :  { %177 = vadd.xlane.f32.xlu0 %v176_v31 }
  0x8f   :  { %v2066_v32 = vsub.f32 %v50_v4, %v65_v29  ;;  %v2068_v33 = vsub.f32 %v49_v0, %v65_v29 }
  0x91   :  { %v69_v34 = vmul.f32 %v2066_v32, %v2066_v32  ;;  %v68_v35 = vmul.f32 %v2068_v33, %v2068_v33 }
  0x93   :  { %v73_v37 = vsel %vm51_vm0, %v69_v34, 0.0  ;;  %v70_v38 = vsel %vm51_vm0, %v68_v35, 0.0  ;;  %v2141_v35 = vld [vmem:[%s2659_s2] sm:$0xff] }
  0x94   :  { %74 = vadd.xlane.f32.xlu2 %v73_v37  ;;  %71 = vadd.xlane.f32.xlu1 %v70_v38  ;;  %v208_v49 = vperm.slane %v2141_v35, 1 }
  0x9c   :  { %174 = vadd.xlane.f32.xlu2 %v173_v41  ;;  %105 = vadd.xlane.f32.xlu1 %v104_v42 }
  0xa2   :  { %302 = vrot.lane.b32.xlu0 %v247_v53, %s1966_s18 }
  0xa4   :  { %108 = vadd.xlane.f32.xlu2 %v107_v44  ;;  %v205_v44 = vperm.slane %v2141_v35, 0 }
 0x101   :  { %v178_v45 = vpop.xlane.xlu0 %177 }
 0x102   :  { %v180_v46 = vmul.f32 %v178_v45, %v2056_v19 }
 0x104   :  { %v2100_v48 = vadd.f32 1e-05, %v180_v46 }
 0x106   :  { %1856 = vrsqrt.f32 %v2100_v48  ;;  %vm199_vm6 = vweird.f32 %v2100_v48 }
 0x107   :  { %v75_v50 = vpop.xlane.xlu2 %74  ;;  %v72_v51 = vpop.xlane.xlu1 %71 }
 0x108   :  { %v76_v54 = vadd.f32 %v75_v50, %v72_v51 }
 0x10a   :  { %v77_v56 = vrot.slane %v76_v54, 4 }
 0x10c   :  { %v78_v57 = vadd.f32 %v77_v56, %v76_v54  ;;  %v1857_v63 = vpop.eup %1856 }
 0x10d   :  { %v194_v5 = vmul.f32 %v1857_v63, %v2100_v48  ;;  %vm200_vm7 = vweird.f32 %v1857_v63 }
 0x10e   :  { %v79_v60 = vrot.slane %v78_v57, 2  ;;  %vm2143_vm9 = vmor %vm199_vm6, %vm200_vm7 }
 0x10f   :  { %v175_v62 = vpop.xlane.xlu2 %174  ;;  %v106_v8 = vpop.xlane.xlu1 %105  ;;  %v195_v10 = vmul.f32 %v1857_v63, %v194_v5  ;;  %v48_v5 = vld [vmem:[%s2661_s4 + $0x18] sm:$0xff] }
 0x110   :  { %v80_v0 = vadd.f32 %v79_v60, %v78_v57  ;;  %v179_v1 = vmul.f32 %v175_v62, %v2056_v19 }
 0x111   :  { %v196_v16 = vmul.f32 0.5, %v195_v10 }
 0x112   :  { %v81_v3 = vrot.slane %v80_v0, 1  ;;  %v181_v4 = vadd.f32 1e-05, %v179_v1 }
 0x113   :  { %v197_v22 = vsub.f32 1.5, %v196_v16 }
 0x114   :  { %v82_v7 = vadd.f32 %v81_v3, %v80_v0  ;;  %1858 = vrsqrt.f32 %v181_v4  ;;  %vm189_vm4 = vweird.f32 %v181_v4  ;;  %v46_v3 = vld [vmem:[%s2661_s4 + $0x8] sm:$0xff] }
 0x115   :  { %v198_v31 = vmul.f32 %v1857_v63, %v197_v22 }
 0x116   :  { %v83_v9 = vmul.f32 0.0023148148, %v82_v7 }
 0x117   :  { %v109_v11 = vpop.xlane.xlu2 %108  ;;  %v202_v47 = vsel %vm2143_vm9, %v1857_v63, %v198_v31 }
 0x118   :  { %v84_v12 = vadd.f32 1e-05, %v83_v9  ;;  %v110_v13 = vadd.f32 %v109_v11, %v106_v8  ;;  %v204_v55 = vmul.f32 %v202_v47, %v2060_v25  ;;  %v47_v25 = vld [vmem:[%s2661_s4 + $0x10] sm:$0xff]  ;;  %v303_v8 = vpop.permute.xlu0 %302 }
 0x119   :  { %1757 = vmatpush.msk.msra.mxu2 %vm260_vm3, %v303_v8  ;;  %vm368_vm3 = vcmask 130048  }
 0x11a   :  { %v1859_v14 = vpop.eup %1858  ;;  %1860 = vrsqrt.f32 %v84_v12  ;;  %v111_v15 = vrot.slane %v110_v13, 4  ;;  %vm91_vm11 = vweird.f32 %v84_v12  ;;  %v207_v63 = vmul.f32 %v205_v44, %v204_v55 }
 0x11b   :  { %v184_v17 = vmul.f32 %v1859_v14, %v181_v4  ;;  %vm190_vm5 = vweird.f32 %v1859_v14 }
 0x11c   :  { %v112_v18 = vadd.f32 %v111_v15, %v110_v13  ;;  %vm191_vm8 = vmor %vm189_vm4, %vm190_vm5  ;;  %v210_v4 = vadd.f32 %v208_v49, %v207_v63 }
 0x11d   :  { %v185_v20 = vmul.f32 %v1859_v14, %v184_v17 }
 0x11e   :  { %v113_v21 = vrot.slane %v112_v18, 2 }
 0x11f   :  { %v186_v23 = vmul.f32 0.5, %v185_v20 }
 0x120   :  { %v1861_v24 = vpop.eup %1860  ;;  %v114_v26 = vadd.f32 %v113_v21, %v112_v18 }
 0x121   :  { %v86_v27 = vmul.f32 %v1861_v24, %v84_v12  ;;  %v187_v28 = vsub.f32 1.5, %v186_v23  ;;  %vm92_vm10 = vweird.f32 %v1861_v24 }
 0x122   :  { %v115_v29 = vrot.slane %v114_v26, 1  ;;  %vm93_vm12 = vmor %vm91_vm11, %vm92_vm10 }
 0x123   :  { %v87_v30 = vmul.f32 %v1861_v24, %v86_v27  ;;  %v188_v34 = vmul.f32 %v1859_v14, %v187_v28 }
 0x124   :  { %v116_v38 = vadd.f32 %v115_v29, %v114_v26 }
 0x125   :  { %v88_v39 = vmul.f32 0.5, %v87_v30  ;;  %v192_v41 = vsel %vm191_vm8, %v1859_v14, %v188_v34 }
 0x126   :  { %v203_v42 = vmul.f32 %v192_v41, %v2075_v36  ;;  %v117_v45 = vmul.f32 0.0023148148, %v116_v38 }
 0x127   :  { %v89_v46 = vsub.f32 1.5, %v88_v39 }
 0x128   :  { %v206_v48 = vmul.f32 %v205_v44, %v203_v42  ;;  %v2153_v50 = vsub.f32 %v2092_v43, %v117_v45  ;;  %v2156_v51 = vsub.f32 %v2084_v40, %v117_v45  ;;  %v2166_v43 = vld [vmem:[%s2661_s4] sm:$0xff] }
 0x129   :  { %v90_v52 = vmul.f32 %v1861_v24, %v89_v46 }
 0x12a   :  { %v209_v36 = vadd.f32 %v208_v49, %v206_v48  ;;  %v121_v53 = vmul.f32 %v2153_v50, %v2153_v50  ;;  %v120_v54 = vmul.f32 %v2156_v51, %v2156_v51 }
 0x12b   :  { %v94_v56 = vsel %vm93_vm12, %v1861_v24, %v90_v52 }
 0x12c   :  { %1750 = vmatmul.msk.f32.vlgmr.msra.gmra.mxu3 %vm153_vm1, %v209_v36  ;;  %v125_v40 = vsel %vm51_vm0, %v121_v53, 0.0  ;;  %v122_v57 = vsel %vm51_vm0, %v120_v54, 0.0  ;;  %v95_v60 = vmul.f32 %v94_v56, %v2068_v33  ;;  %v96_v1 = vmul.f32 %v94_v56, %v2066_v32 }
 0x12d   :  { %126 = vadd.xlane.f32.xlu2 %v125_v40  ;;  %123 = vadd.xlane.f32.xlu1 %v122_v57  ;;  %v1849_v32 = vpack.i.bf16 %v2126_v59, %v2120_v58 }
 0x12e   :  { %v97_v62 = vmul.f32 %v95_v60, %v2166_v43  ;;  %v98_v33 = vmul.f32 %v96_v1, %v46_v3  ;;  %v466_v60 = vld [vmem:[%s2665_s8] sm:$0xff] }
 0x130   :  { %v99_v0 = vadd.f32 %v97_v62, %v47_v25  ;;  %v100_v7 = vadd.f32 %v98_v33, %v48_v5 }
 0x132   :  { %1753 = vmatmul.msk.f32.vlgmr.msra.gmra.mxu1 %vm51_vm0, %v99_v0 }
 0x134   :  { %1751 = vmatmul.msk.f32.gmra.mxu3 %vm153_vm1, %v210_v4 }
 0x13a   :  { %1754 = vmatmul.msk.f32.gmra.mxu1 %vm51_vm0, %v100_v7 }
 0x145   :  { %296 = vrot.lane.b32.xlu2 %v2131_v61, %s1966_s18 }
 0x146   :  { %1850 = vrot.lane.b32.xlu1 %v1849_v32, %s1966_s18 }
 0x1a0   :  { %v127_v9 = vpop.xlane.xlu2 %126  ;;  %v124_v10 = vpop.xlane.xlu1 %123 }
 0x1a1   :  { %v128_v11 = vadd.f32 %v127_v9, %v124_v10 }
 0x1a3   :  { %v129_v12 = vrot.slane %v128_v11, 4 }
 0x1a5   :  { %v130_v13 = vadd.f32 %v129_v12, %v128_v11 }
 0x1a7   :  { %v131_v14 = vrot.slane %v130_v13, 2 }
 0x1a8   :  { %v297_v27 = vpop.permute.xlu2 %296 }
 0x1a9   :  { %v132_v15 = vadd.f32 %v131_v14, %v130_v13 }
 0x1ab   :  { %v133_v16 = vrot.slane %v132_v15, 1 }
 0x1ad   :  { %v134_v17 = vadd.f32 %v133_v16, %v132_v15 }
 0x1af   :  { %v135_v18 = vmul.f32 0.0023148148, %v134_v17  ;;  %v281_v20 = vpop.f32.mrf.mxu1  ;;  %v238_v29 = vpop.f32.mrf.mxu3 }
 0x1b1   :  { %v136_v58 = vadd.f32 1e-05, %v135_v18 }
 0x1b3   :  { %1862 = vrsqrt.f32 %v136_v58  ;;  %vm143_vm14 = vweird.f32 %v136_v58 }
 0x1b7   :  { %v284_v59 = vpop.f32.mrf.mxu1  ;;  %v241_v45 = vpop.f32.mrf.mxu3 }
 0x1b8   :  { %1762 = vmatpush.xpose.msk.msrb.mxu3 %vm338_vm13, %v284_v59  ;;  %v1851_v61 = vpop.permute.xlu1 %1850 }
 0x1b9   :  { %v1863_v21 = vpop.eup %1862  ;;  %v1852_v22 = vunpack.i.l.bf16 %v1851_v61  ;;  %v1853_v23 = vunpack.i.h.bf16 %v1851_v61 }
 0x1ba   :  { %v138_v24 = vmul.f32 %v1863_v21, %v136_v58  ;;  %vm144_vm15 = vweird.f32 %v1863_v21 }
 0x1bb   :  { %322 = vmatpush.msra.mxu2 %v1852_v22  ;;  %vm145_vm2 = vmor %vm143_vm14, %vm144_vm15  ;;  %v517_v22 = vld [vmem:[%s2664_s7 + $0x10] sm:$0xff] }
 0x1bc   :  { %v139_v26 = vmul.f32 %v1863_v21, %v138_v24  ;;  %1763 = vmatpush.xpose.msk.msrb.mxu3 %vm338_vm13, %v281_v20 }
 0x1bd   :  { %323 = vmatpush.msra.mxu2 %v1853_v23  ;;  %v516_v23 = vld [vmem:[%s2664_s7 + $0x8] sm:$0xff] }
 0x1be   :  { %v140_v28 = vmul.f32 0.5, %v139_v26 }
 0x1bf   :  { %324 = vmatpush.msra.mxu2 %v297_v27  ;;  %1764 = vmatmul.msk.f32.vlgmr.msrb.gmra.mxu3 %vm338_vm13, %v238_v29 }
 0x1c0   :  { %v141_v30 = vsub.f32 1.5, %v140_v28  ;;  %1758 = vmatmul.msk.f32.vlgmr.msra.gmra.mxu2 %vm51_vm0, %v99_v0 }
 0x1c2   :  { %v142_v31 = vmul.f32 %v1863_v21, %v141_v30 }
 0x1c4   :  { %v146_v34 = vsel %vm145_vm2, %v1863_v21, %v142_v31  ;;  %v518_v21 = vld [vmem:[%s2664_s7 + $0x18] sm:$0xff] }
 0x1c5   :  { %v147_v37 = vmul.f32 %v146_v34, %v2156_v51  ;;  %v148_v41 = vmul.f32 %v146_v34, %v2153_v50 }
 0x1c7   :  { %v149_v38 = vmul.f32 %v147_v37, %v2166_v43  ;;  %v150_v42 = vmul.f32 %v148_v41, %v46_v3 }
 0x1c8   :  { %1759 = vmatmul.msk.f32.gmra.mxu2 %vm51_vm0, %v100_v7  ;;  %v483_v7 = vperm.slane %v2141_v35, 2 }
 0x1c9   :  { %v151_v39 = vadd.f32 %v149_v38, %v47_v25  ;;  %v152_v44 = vadd.f32 %v150_v42, %v48_v5  ;;  %v563_v38 = vperm.slane %v2141_v35, 3  ;;  %v566_v42 = vperm.slane %v2141_v35, 4 }
 0x1cb   :  { %1755 = vmatmul.msk.f32.gmra.mxu1 %vm51_vm0, %v151_v39 }
 0x1d0   :  { %1760 = vmatmul.msk.f32.gmra.mxu2 %vm51_vm0, %v151_v39 }
 0x1d3   :  { %1756 = vmatmul.msk.f32.gmra.mxu1 %vm51_vm0, %v152_v44 }
 0x1d8   :  { %1761 = vmatmul.msk.f32.gmra.mxu2 %vm51_vm0, %v152_v44 }
 0x242   :  { %v365_v46 = vpop.f32.mrf.mxu3 }
 0x243   :  { %v326_v47 = vpop.f32.mrf.mxu2  ;;  %v369_v48 = vsel %vm368_vm3, %v365_v46, -inf }
 0x244   :  { %370 = vmax.xlane.f32.xlu0 %v369_v48 }
 0x248   :  { %v287_v49 = vpop.f32.mrf.mxu1 }
 0x24b   :  { %v329_v51 = vpop.f32.mrf.mxu2 }
 0x24c   :  { %395 = vmatpush.msra.mxu3 %v329_v51 }
 0x24e   :  { %396 = vmatpush.msra.mxu3 %v326_v47 }
 0x250   :  { %v290_v50 = vpop.f32.mrf.mxu1 }
 0x251   :  { %1766 = vmatpush.xpose.msk.msra.mxu0 %vm338_vm13, %v290_v50  ;;  %v482_v50 = vld [vmem:[%s2665_s8 + $0x80] sm:$0xff] }
 0x252   :  { %618 = vmatpush.msrb.mxu1 %v482_v50 }
 0x253   :  { %v332_v52 = vpop.f32.mrf.mxu2 }
 0x255   :  { %1767 = vmatpush.xpose.msk.msra.mxu0 %vm338_vm13, %v287_v49 }
 0x258   :  { %1768 = vmatmul.msk.f32.vlgmr.msra.gmra.mxu0 %vm338_vm13, %v241_v45 }
 0x259   :  { %505 = vmatpush.msrb.mxu0 %v466_v60  ;;  %v472_v60 = vld [vmem:[%s2665_s8 + $0x30] sm:$0xff] }
 0x25b   :  { %v335_v36 = vpop.f32.mrf.mxu2 }
 0x25c   :  { %458 = vmatpush.msrb.mxu3 %v335_v36  ;;  %v480_v36 = vld [vmem:[%s2665_s8 + $0x70] sm:$0xff] }
 0x25e   :  { %459 = vmatpush.msrb.mxu3 %v332_v52  ;;  %v481_v52 = vld [vmem:[%s2665_s8 + $0x78] sm:$0xff] }
 0x25f   :  { %619 = vmatpush.msrb.mxu1 %v481_v52 }
 0x261   :  { %620 = vmatpush.msrb.mxu1 %v480_v36 }
 0x2b7   :  { %v371_v53 = vpop.xlane.xlu0 %370 }
 0x2b8   :  { %v372_v54 = vsub.f32 %v365_v46, %v371_v53  ;;  %v479_v53 = vld [vmem:[%s2665_s8 + $0x68] sm:$0xff] }
 0x2b9   :  { %621 = vmatpush.msrb.mxu1 %v479_v53 }
 0x2ba   :  { %v373_v55 = vmul.f32 1.442695, %v372_v54  ;;  %v478_v54 = vld [vmem:[%s2665_s8 + $0x60] sm:$0xff] }
 0x2bb   :  { %622 = vmatpush.msrb.mxu1 %v478_v54 }
 0x2bc   :  { %1864 = vpow2.f32 %v373_v55  ;;  %v477_v55 = vld [vmem:[%s2665_s8 + $0x58] sm:$0xff] }
 0x2bd   :  { %623 = vmatpush.msrb.mxu1 %v477_v55 }
 0x2c2   :  { %v1865_v43 = vpop.eup %1864 }
 0x2c3   :  { %1765 = vmatmul.msk.f32.vlgmr.msra.gmra.mxu3 %vm368_vm3, %v1865_v43  ;;  %v375_v56 = vsel %vm368_vm3, %v1865_v43, 0.0  ;;  %v476_v43 = vld [vmem:[%s2665_s8 + $0x50] sm:$0xff] }
 0x2c4   :  { %376 = vadd.xlane.f32.xlu2 %v375_v56  ;;  %588 = vmatpush.msra.mxu3 %v518_v21  ;;  %v475_v56 = vld [vmem:[%s2665_s8 + $0x48] sm:$0xff] }
 0x2c5   :  { %624 = vmatpush.msrb.mxu1 %v476_v43  ;;  %v696_v43 = vld [vmem:[%s2666_s9 + $0x18] sm:$0xff] }
 0x2c6   :  { %589 = vmatpush.msra.mxu3 %v517_v22  ;;  %715 = vmatpush.msrb.mxu2 %v696_v43 }
 0x2c7   :  { %625 = vmatpush.msrb.mxu1 %v475_v56  ;;  %v695_v56 = vld [vmem:[%s2666_s9 + $0x10] sm:$0xff] }
 0x2c8   :  { %590 = vmatpush.msra.mxu3 %v516_v23  ;;  %716 = vmatpush.msrb.mxu2 %v695_v56 }
 0x2d5   :  { %v429_v40 = vpop.f32.mrf.mxu0 }
 0x2d6   :  { %v432_v57 = vsel %vm368_vm3, %v429_v40, -inf }
 0x2d7   :  { %433 = vmax.xlane.f32.xlu1 %v432_v57  ;;  %v473_v57 = vld [vmem:[%s2665_s8 + $0x38] sm:$0xff] }
 0x337   :  { %v377_v25 = vpop.xlane.xlu2 %376 }
 0x338   :  { %1866 = vrcp.f32 %v377_v25  ;;  %v471_v25 = vld [vmem:[%s2665_s8 + $0x28] sm:$0xff] }
 0x33e   :  { %v1867_v62 = vpop.eup %1866 }
 0x346   :  { %v398_v63 = vpop.f32.mrf.mxu3 }
 0x347   :  { %v402_v0 = vmul.f32 %v1867_v62, %v398_v63  ;;  %v470_v62 = vld [vmem:[%s2665_s8 + $0x20] sm:$0xff]  ;;  %v469_v63 = vld [vmem:[%s2665_s8 + $0x18] sm:$0xff] }
 0x349   :  { %1770 = vmatmul.msk.f32.vlgmr.msrb.gmra.mxu0 %vm338_vm13, %v402_v0 }
 0x34a   :  { %v434_v1 = vpop.xlane.xlu1 %433 }
 0x34b   :  { %v435_v3 = vsub.f32 %v429_v40, %v434_v1  ;;  %v474_v40 = vld [vmem:[%s2665_s8 + $0x40] sm:$0xff] }
 0x34c   :  { %626 = vmatpush.msrb.mxu1 %v474_v40  ;;  %v694_v40 = vld [vmem:[%s2666_s9 + $0x8] sm:$0xff] }
 0x34d   :  { %v436_v4 = vmul.f32 1.442695, %v435_v3  ;;  %v468_v3 = vld [vmem:[%s2665_s8 + $0x10] sm:$0xff]  ;;  %717 = vmatpush.msrb.mxu2 %v694_v40 }
 0x34e   :  { %627 = vmatpush.msrb.mxu1 %v473_v57 }
 0x34f   :  { %1868 = vpow2.f32 %v436_v4 }
 0x350   :  { %628 = vmatpush.msrb.mxu1 %v472_v60 }
 0x352   :  { %629 = vmatpush.msrb.mxu1 %v471_v25 }
 0x354   :  { %630 = vmatpush.msrb.mxu1 %v470_v62 }
 0x355   :  { %v1869_v33 = vpop.eup %1868 }
 0x356   :  { %1769 = vmatmul.msk.f32.vlgmr.msrb.gmra.mxu3 %vm368_vm3, %v1869_v33  ;;  %v438_v5 = vsel %vm368_vm3, %v1869_v33, 0.0  ;;  %631 = vmatpush.msrb.mxu1 %v469_v63  ;;  %v467_v33 = vld [vmem:[%s2665_s8 + $0x8] sm:$0xff] }
 0x357   :  { %439 = vadd.xlane.f32.xlu0 %v438_v5  ;;  %v2307_v5 = vld [vmem:[%s2660_s3] sm:$0x7] }
 0x358   :  { %632 = vmatpush.msrb.mxu1 %v468_v3 }
 0x35a   :  { %633 = vmatpush.msrb.mxu1 %v467_v33  ;;  %v687_v33 = vperm.slane %v2141_v35, 6 }
 0x3c6   :  { %v507_v32 = vpop.f32.mrf.mxu0 }
 0x3c7   :  { %v508_v8 = vadd.f32 %v507_v32, %v483_v7 }
 0x3c9   :  { %v2219_v9 = vadd.f32 %v508_v8, %v2041_v2 }
 0x3ca   :  { %v440_v11 = vpop.xlane.xlu0 %439 }
 0x3cb   :  { %v519_v10 = vsel %vm153_vm1, %v2219_v9, 0.0  ;;  %1870 = vrcp.f32 %v440_v11 }
 0x3cc   :  { %520 = vadd.xlane.f32.xlu2 %v519_v10 }
 0x3d1   :  { %v1871_v12 = vpop.eup %1870 }
 0x3d9   :  { %v461_v13 = vpop.f32.mrf.mxu3 }
 0x3da   :  { %v465_v14 = vmul.f32 %v1871_v12, %v461_v13 }
 0x3dc   :  { %1771 = vmatmul.msk.f32.gmra.mxu0 %vm338_vm13, %v465_v14 }
 0x43f   :  { %v521_v15 = vpop.xlane.xlu2 %520 }
 0x440   :  { %v525_v16 = vmul.f32 %v521_v15, %v2056_v19 }
 0x442   :  { %v527_v17 = vsub.f32 %v2219_v9, %v525_v16 }
 0x444   :  { %v529_v18 = vmul.f32 %v527_v17, %v527_v17 }
 0x446   :  { %v531_v2 = vsel %vm153_vm1, %v529_v18, 0.0 }
 0x447   :  { %532 = vadd.xlane.f32.xlu1 %v531_v2 }
 0x459   :  { %v510_v20 = vpop.f32.mrf.mxu0 }
 0x45a   :  { %v511_v58 = vadd.f32 %v510_v20, %v483_v7  ;;  %v569_v7 = vperm.slane %v2307_v5, 0 }
 0x45c   :  { %v2228_v59 = vadd.f32 %v511_v58, %v2052_v6  ;;  %v515_v6 = vld [vmem:[%s2664_s7] sm:$0xff] }
 0x45d   :  { %591 = vmatpush.msra.mxu3 %v515_v6 }
 0x45e   :  { %v522_v61 = vsel %vm153_vm1, %v2228_v59, 0.0 }
 0x45f   :  { %523 = vadd.xlane.f32.xlu0 %v522_v61 }
 0x4ba   :  { %v533_v24 = vpop.xlane.xlu1 %532 }
 0x4bb   :  { %v537_v26 = vmul.f32 %v533_v24, %v2056_v19 }
 0x4bd   :  { %v539_v27 = vadd.f32 1e-05, %v537_v26 }
 0x4bf   :  { %1872 = vrsqrt.f32 %v539_v27  ;;  %vm547_vm4 = vweird.f32 %v539_v27 }
 0x4c5   :  { %v1873_v28 = vpop.eup %1872 }
 0x4c6   :  { %v542_v29 = vmul.f32 %v1873_v28, %v539_v27  ;;  %vm548_vm0 = vweird.f32 %v1873_v28 }
 0x4c7   :  { %vm549_vm5 = vmor %vm547_vm4, %vm548_vm0 }
 0x4c8   :  { %v543_v30 = vmul.f32 %v1873_v28, %v542_v29  ;;  %v617_v29 = vperm.slane %v2141_v35, 5 }
 0x4ca   :  { %v544_v31 = vmul.f32 0.5, %v543_v30 }
 0x4cc   :  { %v545_v34 = vsub.f32 1.5, %v544_v31 }
 0x4ce   :  { %v546_v37 = vmul.f32 %v1873_v28, %v545_v34 }
 0x4d0   :  { %v550_v39 = vsel %vm549_vm5, %v1873_v28, %v546_v37 }
 0x4d1   :  { %v561_v41 = vmul.f32 %v550_v39, %v527_v17 }
 0x4d2   :  { %v524_v44 = vpop.xlane.xlu0 %523 }
 0x4d3   :  { %v564_v45 = vmul.f32 %v563_v38, %v561_v41  ;;  %v526_v46 = vmul.f32 %v524_v44, %v2056_v19 }
 0x4d5   :  { %v528_v47 = vsub.f32 %v2228_v59, %v526_v46  ;;  %v567_v48 = vadd.f32 %v566_v42, %v564_v45 }
 0x4d7   :  { %1772 = vmatmul.msk.f32.vlgmr.msra.gmra.mxu3 %vm153_vm1, %v567_v48  ;;  %v530_v49 = vmul.f32 %v528_v47, %v528_v47 }
 0x4d9   :  { %v534_v51 = vsel %vm153_vm1, %v530_v49, 0.0 }
 0x4da   :  { %535 = vadd.xlane.f32.xlu2 %v534_v51 }
 0x54d   :  { %v536_v0 = vpop.xlane.xlu2 %535 }
 0x54e   :  { %v538_v1 = vmul.f32 %v536_v0, %v2056_v19 }
 0x550   :  { %v540_v4 = vadd.f32 1e-05, %v538_v1 }
 0x552   :  { %1874 = vrsqrt.f32 %v540_v4  ;;  %vm557_vm7 = vweird.f32 %v540_v4 }
 0x558   :  { %v1875_v32 = vpop.eup %1874 }
 0x559   :  { %v552_v8 = vmul.f32 %v1875_v32, %v540_v4  ;;  %vm558_vm6 = vweird.f32 %v1875_v32 }
 0x55a   :  { %v593_v10 = vpop.f32.mrf.mxu3  ;;  %vm559_vm8 = vmor %vm557_vm7, %vm558_vm6 }
 0x55b   :  { %v553_v11 = vmul.f32 %v1875_v32, %v552_v8  ;;  %v594_v12 = vadd.f32 %v593_v10, %v569_v7  ;;  %v690_v8 = vperm.slane %v2141_v35, 7 }
 0x55d   :  { %v554_v13 = vmul.f32 0.5, %v553_v11  ;;  %v599_v14 = vmul.f32 %v594_v12, %v594_v12 }
 0x55f   :  { %v555_v15 = vsub.f32 1.5, %v554_v13  ;;  %v601_v16 = vmul.f32 %v599_v14, %v594_v12 }
 0x561   :  { %v556_v17 = vmul.f32 %v1875_v32, %v555_v15  ;;  %v603_v18 = vmul.f32 0.044715, %v601_v16 }
 0x563   :  { %v560_v2 = vsel %vm559_vm8, %v1875_v32, %v556_v17  ;;  %v605_v20 = vadd.f32 %v603_v18, %v594_v12 }
 0x564   :  { %v562_v58 = vmul.f32 %v560_v2, %v528_v47 }
 0x565   :  { %v607_v61 = vmul.f32 0.7978846, %v605_v20 }
 0x566   :  { %v565_v21 = vmul.f32 %v563_v38, %v562_v58 }
 0x567   :  { %1876 = vtanh.f32 %v607_v61 }
 0x568   :  { %v568_v22 = vadd.f32 %v566_v42, %v565_v21 }
 0x56a   :  { %1773 = vmatmul.msk.f32.gmra.mxu3 %vm153_vm1, %v568_v22 }
 0x56d   :  { %v1877_v23 = vpop.eup %1876 }
 0x56e   :  { %v611_v6 = vadd.f32 1.0, %v1877_v23 }
 0x570   :  { %v613_v24 = vmul.f32 0.5, %v611_v6 }
 0x572   :  { %v615_v26 = vmul.f32 %v613_v24, %v594_v12 }
 0x574   :  { %634 = vmatmul.f32.vlgmr.msrb.gmra.mxu1 %v615_v26 }
 0x5ed   :  { %v596_v27 = vpop.f32.mrf.mxu3 }
 0x5ee   :  { %v597_v28 = vadd.f32 %v596_v27, %v569_v7 }
 0x5f0   :  { %v600_v30 = vmul.f32 %v597_v28, %v597_v28 }
 0x5f1   :  { %v635_v31 = vpop.f32.mrf.mxu1 }
 0x5f2   :  { %v602_v34 = vmul.f32 %v600_v30, %v597_v28  ;;  %v636_v37 = vadd.f32 %v635_v31, %v617_v29 }
 0x5f4   :  { %v2317_v38 = vadd.f32 %v636_v37, %v2219_v9  ;;  %v604_v39 = vmul.f32 0.044715, %v602_v34 }
 0x5f6   :  { %v643_v41 = vsel %vm153_vm1, %v2317_v38, 0.0  ;;  %v606_v42 = vadd.f32 %v604_v39, %v597_v28 }
 0x5f7   :  { %644 = vadd.xlane.f32.xlu1 %v643_v41 }
 0x5f8   :  { %v608_v44 = vmul.f32 0.7978846, %v606_v42 }
 0x5fa   :  { %1878 = vtanh.f32 %v608_v44 }
 0x600   :  { %v1879_v45 = vpop.eup %1878 }
 0x601   :  { %v612_v46 = vadd.f32 1.0, %v1879_v45 }
 0x603   :  { %v614_v47 = vmul.f32 0.5, %v612_v46 }
 0x605   :  { %v616_v48 = vmul.f32 %v614_v47, %v597_v28 }
 0x607   :  { %637 = vmatmul.f32.gmra.mxu1 %v616_v48 }
 0x66a   :  { %v645_v49 = vpop.xlane.xlu1 %644 }
 0x66b   :  { %v649_v51 = vmul.f32 %v645_v49, %v2056_v19 }
 0x66d   :  { %v651_v50 = vsub.f32 %v2317_v38, %v649_v51 }
 0x66f   :  { %v653_v9 = vmul.f32 %v651_v50, %v651_v50 }
 0x671   :  { %v655_v52 = vsel %vm153_vm1, %v653_v9, 0.0 }
 0x672   :  { %656 = vadd.xlane.f32.xlu0 %v655_v52 }
 0x684   :  { %v638_v36 = vpop.f32.mrf.mxu1 }
 0x685   :  { %v639_v53 = vadd.f32 %v638_v36, %v617_v29 }
 0x687   :  { %v2325_v54 = vadd.f32 %v639_v53, %v2228_v59  ;;  %v693_v59 = vld [vmem:[%s2666_s9] sm:$0xff] }
 0x688   :  { %718 = vmatpush.msrb.mxu2 %v693_v59 }
 0x689   :  { %v646_v55 = vsel %vm153_vm1, %v2325_v54, 0.0 }
 0x68a   :  { %647 = vadd.xlane.f32.xlu2 %v646_v55 }
 0x6e5   :  { %v657_v57 = vpop.xlane.xlu0 %656 }
 0x6e6   :  { %v661_v60 = vmul.f32 %v657_v57, %v2056_v19 }
 0x6e8   :  { %v663_v25 = vadd.f32 1e-05, %v661_v60 }
 0x6ea   :  { %1880 = vrsqrt.f32 %v663_v25  ;;  %vm671_vm10 = vweird.f32 %v663_v25 }
 0x6f0   :  { %v1881_v62 = vpop.eup %1880 }
 0x6f1   :  { %v666_v63 = vmul.f32 %v1881_v62, %v663_v25  ;;  %vm672_vm9 = vweird.f32 %v1881_v62 }
 0x6f2   :  { %vm673_vm11 = vmor %vm671_vm10, %vm672_vm9 }
 0x6f3   :  { %v667_v0 = vmul.f32 %v1881_v62, %v666_v63 }
 0x6f5   :  { %v668_v1 = vmul.f32 0.5, %v667_v0 }
 0x6f7   :  { %v669_v3 = vsub.f32 1.5, %v668_v1 }
 0x6f9   :  { %v670_v4 = vmul.f32 %v1881_v62, %v669_v3 }
 0x6fb   :  { %v674_v7 = vsel %vm673_vm11, %v1881_v62, %v670_v4 }
 0x6fc   :  { %v685_v32 = vmul.f32 %v674_v7, %v651_v50 }
 0x6fd   :  { %v648_v10 = vpop.xlane.xlu2 %647 }
 0x6fe   :  { %v650_v11 = vmul.f32 %v648_v10, %v2056_v19  ;;  %v688_v12 = vmul.f32 %v687_v33, %v685_v32 }
 0x700   :  { %v652_v13 = vsub.f32 %v2325_v54, %v650_v11  ;;  %v691_v14 = vadd.f32 %v690_v8, %v688_v12 }
 0x702   :  { %1774 = vmatmul.msk.f32.vlgmr.msrb.gmra.mxu2 %vm153_vm1, %v691_v14  ;;  %v654_v15 = vmul.f32 %v652_v13, %v652_v13 }
 0x704   :  { %v658_v16 = vsel %vm153_vm1, %v654_v15, 0.0  ;;  %v994_v15 = vld [vmem:[%s2667_s10] sm:$0xff] }
 0x705   :  { %659 = vadd.xlane.f32.xlu1 %v658_v16 }
 0x778   :  { %v660_v17 = vpop.xlane.xlu1 %659 }
 0x779   :  { %v662_v18 = vmul.f32 %v660_v17, %v2056_v19 }
 0x77b   :  { %v664_v2 = vadd.f32 1e-05, %v662_v18 }
 0x77d   :  { %1882 = vrsqrt.f32 %v664_v2  ;;  %vm681_vm14 = vweird.f32 %v664_v2 }
 0x783   :  { %v1883_v20 = vpop.eup %1882 }
 0x784   :  { %v676_v35 = vmul.f32 %v1883_v20, %v664_v2  ;;  %vm682_vm12 = vweird.f32 %v1883_v20 }
 0x785   :  { %v720_v58 = vpop.f32.mrf.mxu2  ;;  %vm683_vm15 = vmor %vm681_vm14, %vm682_vm12 }
 0x786   :  { %v677_v61 = vmul.f32 %v1883_v20, %v676_v35  ;;  %790 = vrot.lane.b32.xlu1 %v720_v58, %s1966_s18  ;;  %792 = vrot.lane.b32.xlu2 %v720_v58, %s1967_s16 }
 0x787   :  { %727 = vrot.lane.b32.xlu0 %v720_v58, %s1968_s17 }
 0x788   :  { %v678_v21 = vmul.f32 0.5, %v677_v61 }
 0x78a   :  { %v679_v22 = vsub.f32 1.5, %v678_v21 }
 0x78c   :  { %v680_v23 = vmul.f32 %v1883_v20, %v679_v22 }
 0x78e   :  { %v684_v6 = vsel %vm683_vm15, %v1883_v20, %v680_v23  ;;  %827 = vrot.lane.b32.xlu1 %v720_v58, %s1969_s19 }
 0x78f   :  { %v686_v24 = vmul.f32 %v684_v6, %v652_v13  ;;  %v995_v13 = vld [vmem:[%s2667_s10 + $0x8] sm:$0xff] }
 0x791   :  { %v689_v26 = vmul.f32 %v687_v33, %v686_v24 }
 0x793   :  { %v692_v27 = vadd.f32 %v690_v8, %v689_v26 }
 0x795   :  { %1775 = vmatmul.msk.f32.gmra.mxu2 %vm153_vm1, %v692_v27 }
 0x7e0   :  { %v793_v30 = vpop.permute.xlu2 %792 }
 0x7f8   :  { %v791_v28 = vpop.permute.xlu1 %790 }
 0x7f9   :  { %v728_v29 = vpop.permute.xlu0 %727 }
 0x7fa   :  { %1776 = vmatpush.xpose.msk.msra.mxu0 %vm338_vm13, %v728_v29  ;;  %v2395_v29 = vld [vmem:[%s2659_s2 + $0x8] sm:$0xff] }
 0x7fd   :  { %1777 = vmatmul.msk.f32.vlgmr.msra.gmra.mxu0 %vm338_vm13, %v720_v58 }
 0x7fe   :  { %1779 = vmatpush.xpose.msk.msrb.mxu0 %vm338_vm13, %v793_v30  ;;  %v1012_v30 = vperm.slane %v2395_v29, 0 }
 0x800   :  { %v828_v31 = vpop.permute.xlu1 %827 }
 0x801   :  { %848 = vmatpush.msra.mxu1 %v828_v31 }
 0x805   :  { %1780 = vmatmul.msk.f32.vlgmr.msrb.gmra.mxu0 %vm338_vm13, %v791_v28 }
 0x818   :  { %v723_v34 = vpop.f32.mrf.mxu2 }
 0x819   :  { %924 = vrot.lane.b32.xlu2 %v723_v34, %s1966_s18  ;;  %926 = vrot.lane.b32.xlu0 %v723_v34, %s1967_s16 }
 0x821   :  { %861 = vrot.lane.b32.xlu2 %v723_v34, %s1968_s17 }
 0x829   :  { %762 = vrot.lane.b32.xlu2 %v720_v58, %s1970_s20 }
 0x873   :  { %v925_v37 = vpop.permute.xlu2 %924 }
 0x87a   :  { %v750_v39 = vpop.f32.mrf.mxu0 }
 0x87b   :  { %v753_v41 = vsel %vm338_vm13, %v750_v39, -inf  ;;  %v862_v42 = vpop.permute.xlu2 %861 }
 0x87c   :  { %754 = vmax.xlane.f32.xlu1 %v753_v41  ;;  %1782 = vmatpush.xpose.msk.msra.mxu2 %vm338_vm13, %v862_v42 }
 0x87f   :  { %1783 = vmatmul.msk.f32.vlgmr.msra.gmra.mxu2 %vm338_vm13, %v723_v34 }
 0x880   :  { %1033 = vmatpush.msrb.mxu2 %v995_v13 }
 0x882   :  { %v815_v44 = vpop.f32.mrf.mxu0  ;;  %1034 = vmatpush.msrb.mxu2 %v994_v15 }
 0x883   :  { %v763_v45 = vpop.permute.xlu2 %762  ;;  %v818_v46 = vsel %vm338_vm13, %v815_v44, -inf }
 0x884   :  { %819 = vmax.xlane.f32.xlu0 %v818_v46  ;;  %783 = vmatpush.msrb.mxu3 %v763_v45 }
 0x88b   :  { %v927_v47 = vpop.permute.xlu0 %926 }
 0x88c   :  { %1785 = vmatpush.xpose.msk.msra.mxu0 %vm338_vm13, %v927_v47 }
 0x88f   :  { %1786 = vmatmul.msk.f32.vlgmr.msra.gmra.mxu0 %vm338_vm13, %v925_v37 }
 0x895   :  { %961 = vrot.lane.b32.xlu1 %v723_v34, %s1969_s19 }
 0x8ef   :  { %v755_v48 = vpop.xlane.xlu1 %754 }
 0x8f0   :  { %v756_v49 = vsub.f32 %v750_v39, %v755_v48 }
 0x8f2   :  { %v757_v51 = vmul.f32 1.442695, %v756_v49 }
 0x8f4   :  { %1884 = vpow2.f32 %v757_v51  ;;  %v1793_v51 = vld [vmem:[%s2664_s7 + $0x38] sm:$0xff] }
 0x8f7   :  { %v820_v50 = vpop.xlane.xlu0 %819 }
 0x8f8   :  { %v821_v9 = vsub.f32 %v815_v44, %v820_v50  ;;  %v1792_v50 = vld [vmem:[%s2664_s7 + $0x30] sm:$0xff] }
 0x8fa   :  { %v1885_v52 = vpop.eup %1884  ;;  %v822_v36 = vmul.f32 1.442695, %v821_v9 }
 0x8fb   :  { %1778 = vmatmul.msk.f32.vlgmr.msrb.gmra.mxu3 %vm338_vm13, %v1885_v52  ;;  %v759_v60 = vsel %vm338_vm13, %v1885_v52, 0.0  ;;  %v1791_v52 = vld [vmem:[%s2664_s7 + $0x28] sm:$0xff] }
 0x8fc   :  { %1886 = vpow2.f32 %v822_v36  ;;  %v1790_v36 = vld [vmem:[%s2664_s7 + $0x20] sm:$0xff] }
 0x902   :  { %v1887_v53 = vpop.eup %1886  ;;  %v884_v56 = vpop.f32.mrf.mxu2 }
 0x903   :  { %1781 = vmatmul.msk.f32.vlgmr.msra.gmra.mxu1 %vm338_vm13, %v1887_v53  ;;  %v824_v55 = vsel %vm338_vm13, %v1887_v53, 0.0  ;;  %v887_v40 = vsel %vm338_vm13, %v884_v56, -inf }
 0x904   :  { %825 = vadd.xlane.f32.xlu2 %v824_v55 }
 0x907   :  { %v962_v43 = vpop.permute.xlu1 %961 }
 0x908   :  { %982 = vmatpush.msrb.mxu1 %v962_v43 }
 0x90c   :  { %888 = vmax.xlane.f32.xlu2 %v887_v40  ;;  %v949_v59 = vpop.f32.mrf.mxu0 }
 0x90d   :  { %v952_v57 = vsel %vm338_vm13, %v949_v59, -inf }
 0x90e   :  { %953 = vmax.xlane.f32.xlu0 %v952_v57 }
 0x916   :  { %760 = vadd.xlane.f32.xlu0 %v759_v60 }
 0x924   :  { %896 = vrot.lane.b32.xlu2 %v723_v34, %s1970_s20 }
 0x977   :  { %v826_v25 = vpop.xlane.xlu2 %825 }
 0x978   :  { %1888 = vrcp.f32 %v826_v25 }
 0x97e   :  { %v1889_v63 = vpop.eup %1888  ;;  %v785_v18 = vpop.f32.mrf.mxu3 }
 0x97f   :  { %v889_v62 = vpop.xlane.xlu2 %888 }
 0x980   :  { %v890_v0 = vsub.f32 %v884_v56, %v889_v62  ;;  %v850_v1 = vpop.f32.mrf.mxu1 }
 0x981   :  { %v854_v3 = vmul.f32 %v1889_v63, %v850_v1  ;;  %v954_v4 = vpop.xlane.xlu0 %953  ;;  %v1093_v1 = vperm.slane %v2395_v29, 1 }
 0x982   :  { %v891_v33 = vmul.f32 1.442695, %v890_v0  ;;  %v955_v7 = vsub.f32 %v949_v59, %v954_v4 }
 0x983   :  { %856 = vrot.lane.b32.xlu0 %v854_v3, %s1971_s21 }
 0x984   :  { %1890 = vpow2.f32 %v891_v33  ;;  %v956_v32 = vmul.f32 1.442695, %v955_v7  ;;  %v1096_v33 = vperm.slane %v2395_v29, 2 }
 0x986   :  { %1892 = vpow2.f32 %v956_v32 }
 0x987   :  { %v897_v8 = vpop.permute.xlu2 %896 }
 0x988   :  { %917 = vmatpush.msra.mxu3 %v897_v8  ;;  %v1011_v8 = vld [vmem:[%s2667_s10 + $0x88] sm:$0xff] }
 0x989   :  { %v761_v16 = vpop.xlane.xlu0 %760  ;;  %1148 = vmatpush.msrb.mxu0 %v1011_v8 }
 0x98a   :  { %v1891_v10 = vpop.eup %1890  ;;  %1894 = vrcp.f32 %v761_v16  ;;  %1118 = vmatpush.msrb.mxu3 %v1793_v51 }
 0x98b   :  { %1784 = vmatmul.msk.f32.vlgmr.msra.gmra.mxu3 %vm338_vm13, %v1891_v10  ;;  %v893_v14 = vsel %vm338_vm13, %v1891_v10, 0.0  ;;  %v1010_v10 = vld [vmem:[%s2667_s10 + $0x80] sm:$0xff] }
 0x98c   :  { %v1893_v11 = vpop.eup %1892  ;;  %1119 = vmatpush.msrb.mxu3 %v1792_v50  ;;  %1149 = vmatpush.msrb.mxu0 %v1010_v10 }
 0x98d   :  { %1787 = vmatmul.msk.f32.vlgmr.msrb.gmra.mxu1 %vm338_vm13, %v1893_v11  ;;  %v958_v12 = vsel %vm338_vm13, %v1893_v11, 0.0  ;;  %v1009_v11 = vld [vmem:[%s2667_s10 + $0x78] sm:$0xff] }
 0x98e   :  { %959 = vadd.xlane.f32.xlu1 %v958_v12  ;;  %1120 = vmatpush.msrb.mxu3 %v1791_v52 }
 0x98f   :  { %1150 = vmatpush.msrb.mxu0 %v1009_v11 }
 0x990   :  { %v1895_v17 = vpop.eup %1894  ;;  %1121 = vmatpush.msrb.mxu3 %v1790_v36 }
 0x991   :  { %v789_v2 = vmul.f32 %v1895_v17, %v785_v18  ;;  %v1008_v18 = vld [vmem:[%s2667_s10 + $0x70] sm:$0xff] }
 0x992   :  { %1151 = vmatpush.msrb.mxu0 %v1008_v18  ;;  %v1796_v18 = vld [vmem:[%s2666_s9 + $0x20] sm:$0xff] }
 0x9ad   :  { %894 = vadd.xlane.f32.xlu0 %v893_v14 }
 0x9f5   :  { %v857_v20 = vpop.permute.xlu0 %856 }
 0x9f6   :  { %v859_v35 = vsel %vm338_vm13, %v789_v2, %v857_v20  ;;  %v1007_v20 = vld [vmem:[%s2667_s10 + $0x68] sm:$0xff] }
 0x9f7   :  { %1788 = vmatmul.msk.f32.vlgmr.msrb.gmra.mxu2 %vm368_vm3, %v859_v35  ;;  %1152 = vmatpush.msrb.mxu0 %v1007_v20 }
 0xa01   :  { %v960_v58 = vpop.xlane.xlu1 %959 }
 0xa02   :  { %1896 = vrcp.f32 %v960_v58  ;;  %v1006_v58 = vld [vmem:[%s2667_s10 + $0x60] sm:$0xff] }
 0xa03   :  { %1153 = vmatpush.msrb.mxu0 %v1006_v58 }
 0xa08   :  { %v1897_v61 = vpop.eup %1896 }
 0xa0a   :  { %v984_v21 = vpop.f32.mrf.mxu1 }
 0xa0b   :  { %v988_v22 = vmul.f32 %v1897_v61, %v984_v21  ;;  %v1005_v21 = vld [vmem:[%s2667_s10 + $0x58] sm:$0xff] }
 0xa0c   :  { %1154 = vmatpush.msrb.mxu0 %v1005_v21 }
 0xa0d   :  { %990 = vrot.lane.b32.xlu2 %v988_v22, %s1971_s21 }
 0xa0e   :  { %v919_v24 = vpop.f32.mrf.mxu3 }
 0xa20   :  { %v895_v23 = vpop.xlane.xlu0 %894 }
 0xa21   :  { %1898 = vrcp.f32 %v895_v23  ;;  %v1004_v23 = vld [vmem:[%s2667_s10 + $0x50] sm:$0xff] }
 0xa22   :  { %1155 = vmatpush.msrb.mxu0 %v1004_v23 }
 0xa27   :  { %v1899_v6 = vpop.eup %1898 }
 0xa28   :  { %v923_v26 = vmul.f32 %v1899_v6, %v919_v24  ;;  %v1003_v24 = vld [vmem:[%s2667_s10 + $0x48] sm:$0xff] }
 0xa29   :  { %1156 = vmatpush.msrb.mxu0 %v1003_v24 }
 0xa67   :  { %v991_v27 = vpop.permute.xlu2 %990 }
 0xa68   :  { %v993_v28 = vsel %vm338_vm13, %v923_v26, %v991_v27  ;;  %v1002_v27 = vld [vmem:[%s2667_s10 + $0x40] sm:$0xff] }
 0xa69   :  { %1789 = vmatmul.msk.f32.gmra.mxu2 %vm368_vm3, %v993_v28  ;;  %1157 = vmatpush.msrb.mxu0 %v1002_v27 }
 0xa7a   :  { %v1036_v31 = vpop.f32.mrf.mxu2 }
 0xa7b   :  { %v1037_v34 = vadd.f32 %v1036_v31, %v1012_v30  ;;  %v1000_v31 = vld [vmem:[%s2667_s10 + $0x30] sm:$0xff] }
 0xa7d   :  { %v2399_v37 = vadd.f32 %v1037_v34, %v2317_v38  ;;  %v999_v34 = vld [vmem:[%s2667_s10 + $0x28] sm:$0xff] }
 0xa7f   :  { %v1049_v39 = vsel %vm153_vm1, %v2399_v37, 0.0 }
 0xa80   :  { %1050 = vadd.xlane.f32.xlu2 %v1049_v39  ;;  %v998_v39 = vld [vmem:[%s2667_s10 + $0x20] sm:$0xff] }
 0xaec   :  { %v1039_v41 = vpop.f32.mrf.mxu2 }
 0xaed   :  { %v1040_v42 = vadd.f32 %v1039_v41, %v1012_v30  ;;  %v1001_v30 = vld [vmem:[%s2667_s10 + $0x38] sm:$0xff] }
 0xaee   :  { %1158 = vmatpush.msrb.mxu0 %v1001_v30  ;;  %v997_v41 = vld [vmem:[%s2667_s10 + $0x18] sm:$0xff] }
 0xaef   :  { %v2404_v44 = vadd.f32 %v1040_v42, %v2325_v54  ;;  %v996_v42 = vld [vmem:[%s2667_s10 + $0x10] sm:$0xff] }
 0xaf0   :  { %1159 = vmatpush.msrb.mxu0 %v1000_v31 }
 0xaf1   :  { %v1052_v45 = vsel %vm153_vm1, %v2404_v44, 0.0 }
 0xaf2   :  { %1053 = vadd.xlane.f32.xlu0 %v1052_v45  ;;  %1160 = vmatpush.msrb.mxu0 %v999_v34  ;;  %v1099_v45 = vperm.slane %v2307_v5, 1  ;;  %v1220_v34 = vperm.slane %v2395_v29, 5 }
 0xaf3   :  { %v1051_v46 = vpop.xlane.xlu2 %1050 }
 0xaf4   :  { %v1055_v47 = vmul.f32 %v1051_v46, %v2056_v19  ;;  %1161 = vmatpush.msrb.mxu0 %v998_v39 }
 0xaf6   :  { %v1057_v48 = vsub.f32 %v2399_v37, %v1055_v47  ;;  %1162 = vmatpush.msrb.mxu0 %v997_v41 }
 0xaf8   :  { %v1059_v38 = vmul.f32 %v1057_v48, %v1057_v48  ;;  %1163 = vmatpush.msrb.mxu0 %v996_v42 }
 0xafa   :  { %v1061_v49 = vsel %vm153_vm1, %v1059_v38, 0.0 }
 0xafb   :  { %1062 = vadd.xlane.f32.xlu1 %v1061_v49 }
 0xb65   :  { %v1054_v54 = vpop.xlane.xlu0 %1053 }
 0xb66   :  { %v1056_v9 = vmul.f32 %v1054_v54, %v2056_v19 }
 0xb68   :  { %v1058_v53 = vsub.f32 %v2404_v44, %v1056_v9 }
 0xb6a   :  { %v1060_v55 = vmul.f32 %v1058_v53, %v1058_v53 }
 0xb6c   :  { %v1064_v43 = vsel %vm153_vm1, %v1060_v55, 0.0 }
 0xb6d   :  { %1065 = vadd.xlane.f32.xlu1 %v1064_v43 }
 0xb6e   :  { %v1063_v56 = vpop.xlane.xlu1 %1062 }
 0xb6f   :  { %v1067_v40 = vmul.f32 %v1063_v56, %v2056_v19 }
 0xb71   :  { %v1069_v59 = vadd.f32 1e-05, %v1067_v40 }
 0xb73   :  { %1900 = vrsqrt.f32 %v1069_v59  ;;  %vm1077_vm0 = vweird.f32 %v1069_v59 }
 0xb79   :  { %v1901_v57 = vpop.eup %1900 }
 0xb7a   :  { %v1072_v60 = vmul.f32 %v1901_v57, %v1069_v59  ;;  %vm1078_vm2 = vweird.f32 %v1901_v57 }
 0xb7b   :  { %vm1079_vm4 = vmor %vm1077_vm0, %vm1078_vm2 }
 0xb7c   :  { %v1073_v25 = vmul.f32 %v1901_v57, %v1072_v60 }
 0xb7e   :  { %v1074_v62 = vmul.f32 0.5, %v1073_v25 }
 0xb80   :  { %v1075_v63 = vsub.f32 1.5, %v1074_v62 }
 0xb82   :  { %v1076_v0 = vmul.f32 %v1901_v57, %v1075_v63  ;;  %v1147_v63 = vperm.slane %v2395_v29, 3 }
 0xb84   :  { %v1080_v3 = vsel %vm1079_vm4, %v1901_v57, %v1076_v0 }
 0xb85   :  { %v1091_v4 = vmul.f32 %v1080_v3, %v1057_v48 }
 0xb87   :  { %v1094_v7 = vmul.f32 %v1093_v1, %v1091_v4 }
 0xb89   :  { %v1097_v32 = vadd.f32 %v1096_v33, %v1094_v7 }
 0xb8b   :  { %1794 = vmatmul.msk.f32.vlgmr.msrb.gmra.mxu3 %vm153_vm1, %v1097_v32 }
 0xbe0   :  { %v1066_v12 = vpop.xlane.xlu1 %1065 }
 0xbe1   :  { %v1068_v13 = vmul.f32 %v1066_v12, %v2056_v19 }
 0xbe3   :  { %v1070_v14 = vadd.f32 1e-05, %v1068_v13 }
 0xbe5   :  { %1902 = vrsqrt.f32 %v1070_v14  ;;  %vm1087_vm6 = vweird.f32 %v1070_v14 }
 0xbeb   :  { %v1903_v15 = vpop.eup %1902 }
 0xbec   :  { %v1082_v16 = vmul.f32 %v1903_v15, %v1070_v14  ;;  %vm1088_vm5 = vweird.f32 %v1903_v15  ;;  %v1799_v14 = vld [vmem:[%s2666_s9 + $0x38] sm:$0xff] }
 0xbed   :  { %vm1089_vm7 = vmor %vm1087_vm6, %vm1088_vm5  ;;  %1246 = vmatpush.msra.mxu1 %v1799_v14  ;;  %vm1730_vm6 = vcmask 254976  }
 0xbee   :  { %v1083_v17 = vmul.f32 %v1903_v15, %v1082_v16 }
 0xbf0   :  { %v1084_v2 = vmul.f32 0.5, %v1083_v17  ;;  %v1797_v17 = vld [vmem:[%s2666_s9 + $0x28] sm:$0xff] }
 0xbf2   :  { %v1085_v35 = vsub.f32 1.5, %v1084_v2 }
 0xbf4   :  { %v1086_v61 = vmul.f32 %v1903_v15, %v1085_v35 }
 0xbf6   :  { %v1090_v22 = vsel %vm1089_vm7, %v1903_v15, %v1086_v61  ;;  %v1798_v15 = vld [vmem:[%s2666_s9 + $0x30] sm:$0xff] }
 0xbf7   :  { %v1092_v6 = vmul.f32 %v1090_v22, %v1058_v53  ;;  %1247 = vmatpush.msra.mxu1 %v1798_v15 }
 0xbf9   :  { %v1095_v26 = vmul.f32 %v1093_v1, %v1092_v6  ;;  %1248 = vmatpush.msra.mxu1 %v1797_v17 }
 0xbfb   :  { %v1098_v28 = vadd.f32 %v1096_v33, %v1095_v26  ;;  %1249 = vmatpush.msra.mxu1 %v1796_v18 }
 0xbfd   :  { %1795 = vmatmul.msk.f32.gmra.mxu3 %vm153_vm1, %v1098_v28  ;;  %v1217_v28 = vperm.slane %v2395_v29, 4 }
 0xc0e   :  { %v1123_v46 = vpop.f32.mrf.mxu3 }
 0xc0f   :  { %v1124_v47 = vadd.f32 %v1123_v46, %v1099_v45 }
 0xc11   :  { %v1129_v48 = vmul.f32 %v1124_v47, %v1124_v47 }
 0xc13   :  { %v1131_v38 = vmul.f32 %v1129_v48, %v1124_v47 }
 0xc15   :  { %v1133_v49 = vmul.f32 0.044715, %v1131_v38 }
 0xc17   :  { %v1135_v51 = vadd.f32 %v1133_v49, %v1124_v47 }
 0xc19   :  { %v1137_v54 = vmul.f32 0.7978846, %v1135_v51 }
 0xc1b   :  { %1904 = vtanh.f32 %v1137_v54 }
 0xc21   :  { %v1905_v50 = vpop.eup %1904 }
 0xc22   :  { %v1141_v9 = vadd.f32 1.0, %v1905_v50 }
 0xc24   :  { %v1143_v52 = vmul.f32 0.5, %v1141_v9 }
 0xc26   :  { %v1145_v36 = vmul.f32 %v1143_v52, %v1124_v47 }
 0xc28   :  { %1164 = vmatmul.f32.vlgmr.msrb.gmra.mxu0 %v1145_v36 }
 0xc80   :  { %v1126_v53 = vpop.f32.mrf.mxu3 }
 0xc81   :  { %v1127_v55 = vadd.f32 %v1126_v53, %v1099_v45 }
 0xc83   :  { %v1130_v43 = vmul.f32 %v1127_v55, %v1127_v55 }
 0xc85   :  { %v1132_v56 = vmul.f32 %v1130_v43, %v1127_v55 }
 0xc87   :  { %v1134_v40 = vmul.f32 0.044715, %v1132_v56 }
 0xc89   :  { %v1136_v59 = vadd.f32 %v1134_v40, %v1127_v55 }
 0xc8b   :  { %v1138_v5 = vmul.f32 0.7978846, %v1136_v59 }
 0xc8d   :  { %1906 = vtanh.f32 %v1138_v5 }
 0xc93   :  { %v1907_v57 = vpop.eup %1906 }
 0xc94   :  { %v1142_v60 = vadd.f32 1.0, %v1907_v57 }
 0xc96   :  { %v1144_v25 = vmul.f32 0.5, %v1142_v60 }
 0xc98   :  { %v1146_v62 = vmul.f32 %v1144_v25, %v1127_v55 }
 0xc9a   :  { %1167 = vmatmul.f32.gmra.mxu0 %v1146_v62 }
 0xca5   :  { %v1165_v0 = vpop.f32.mrf.mxu0 }
 0xca6   :  { %v1166_v1 = vadd.f32 %v1165_v0, %v1147_v63 }
 0xca8   :  { %v2483_v3 = vadd.f32 %v1166_v1, %v2399_v37 }
 0xcaa   :  { %v1173_v4 = vsel %vm153_vm1, %v2483_v3, 0.0 }
 0xcab   :  { %1174 = vadd.xlane.f32.xlu0 %v1173_v4 }
 0xd17   :  { %v1168_v33 = vpop.f32.mrf.mxu0 }
 0xd18   :  { %v1169_v7 = vadd.f32 %v1168_v33, %v1147_v63 }
 0xd1a   :  { %v2488_v32 = vadd.f32 %v1169_v7, %v2404_v44 }
 0xd1c   :  { %v1176_v8 = vsel %vm153_vm1, %v2488_v32, 0.0 }
 0xd1d   :  { %1177 = vadd.xlane.f32.xlu0 %v1176_v8 }
 0xd1e   :  { %v1175_v10 = vpop.xlane.xlu0 %1174 }
 0xd1f   :  { %v1179_v11 = vmul.f32 %v1175_v10, %v2056_v19 }
 0xd21   :  { %v1181_v12 = vsub.f32 %v2483_v3, %v1179_v11 }
 0xd23   :  { %v1183_v37 = vmul.f32 %v1181_v12, %v1181_v12 }
 0xd25   :  { %v1185_v13 = vsel %vm153_vm1, %v1183_v37, 0.0 }
 0xd26   :  { %1186 = vadd.xlane.f32.xlu1 %v1185_v13 }
 0xd90   :  { %v1178_v44 = vpop.xlane.xlu0 %1177 }
 0xd91   :  { %v1180_v16 = vmul.f32 %v1178_v44, %v2056_v19 }
 0xd93   :  { %v1182_v2 = vsub.f32 %v2488_v32, %v1180_v16 }
 0xd95   :  { %v1184_v20 = vmul.f32 %v1182_v2, %v1182_v2 }
 0xd97   :  { %v1188_v35 = vsel %vm153_vm1, %v1184_v20, 0.0 }
 0xd98   :  { %1189 = vadd.xlane.f32.xlu1 %v1188_v35 }
 0xd99   :  { %v1187_v58 = vpop.xlane.xlu1 %1186 }
 0xd9a   :  { %v1191_v61 = vmul.f32 %v1187_v58, %v2056_v19 }
 0xd9c   :  { %v1193_v21 = vadd.f32 1e-05, %v1191_v61 }
 0xd9e   :  { %1908 = vrsqrt.f32 %v1193_v21  ;;  %vm1201_vm9 = vweird.f32 %v1193_v21 }
 0xda4   :  { %v1909_v22 = vpop.eup %1908 }
 0xda5   :  { %v1196_v23 = vmul.f32 %v1909_v22, %v1193_v21  ;;  %vm1202_vm8 = vweird.f32 %v1909_v22 }
 0xda6   :  { %vm1203_vm10 = vmor %vm1201_vm9, %vm1202_vm8 }
 0xda7   :  { %v1197_v6 = vmul.f32 %v1909_v22, %v1196_v23 }
 0xda9   :  { %v1198_v24 = vmul.f32 0.5, %v1197_v6 }
 0xdab   :  { %v1199_v26 = vsub.f32 1.5, %v1198_v24 }
 0xdad   :  { %v1200_v27 = vmul.f32 %v1909_v22, %v1199_v26 }
 0xdaf   :  { %v1204_v30 = vsel %vm1203_vm10, %v1909_v22, %v1200_v27 }
 0xdb0   :  { %v1215_v31 = vmul.f32 %v1204_v30, %v1181_v12 }
 0xdb2   :  { %v1218_v39 = vmul.f32 %v1217_v28, %v1215_v31 }
 0xdb4   :  { %v1221_v41 = vadd.f32 %v1220_v34, %v1218_v39  ;;  %v1815_v39 = vld [vmem:[%s2667_s10 + $0x98] sm:$0xff] }
 0xdb6   :  { %1800 = vmatmul.msk.f32.vlgmr.msra.gmra.mxu1 %vm153_vm1, %v1221_v41  ;;  %v1814_v41 = vld [vmem:[%s2667_s10 + $0x90] sm:$0xff] }
 0xe0b   :  { %v1190_v42 = vpop.xlane.xlu1 %1189 }
 0xe0c   :  { %v1192_v45 = vmul.f32 %v1190_v42, %v2056_v19 }
 0xe0e   :  { %v1194_v46 = vadd.f32 1e-05, %v1192_v45 }
 0xe10   :  { %1910 = vrsqrt.f32 %v1194_v46  ;;  %vm1211_vm12 = vweird.f32 %v1194_v46 }
 0xe16   :  { %v1911_v47 = vpop.eup %1910 }
 0xe17   :  { %v1206_v48 = vmul.f32 %v1911_v47, %v1194_v46  ;;  %vm1212_vm11 = vweird.f32 %v1911_v47 }
 0xe18   :  { %vm1213_vm14 = vmor %vm1211_vm12, %vm1212_vm11 }
 0xe19   :  { %v1207_v38 = vmul.f32 %v1911_v47, %v1206_v48 }
 0xe1b   :  { %v1208_v49 = vmul.f32 0.5, %v1207_v38 }
 0xe1d   :  { %v1209_v51 = vsub.f32 1.5, %v1208_v49 }
 0xe1f   :  { %v1210_v54 = vmul.f32 %v1911_v47, %v1209_v51 }
 0xe21   :  { %v1214_v50 = vsel %vm1213_vm14, %v1911_v47, %v1210_v54 }
 0xe22   :  { %v1216_v9 = vmul.f32 %v1214_v50, %v1182_v2 }
 0xe24   :  { %v1219_v52 = vmul.f32 %v1217_v28, %v1216_v9 }
 0xe26   :  { %v1222_v36 = vadd.f32 %v1220_v34, %v1219_v52 }
 0xe28   :  { %1801 = vmatmul.msk.f32.gmra.mxu1 %vm153_vm1, %v1222_v36 }
 0xe33   :  { %v1251_v53 = vpop.f32.mrf.mxu1 }
 0xe34   :  { %1321 = vrot.lane.b32.xlu2 %v1251_v53, %s1966_s18  ;;  %1323 = vrot.lane.b32.xlu0 %v1251_v53, %s1967_s16 }
 0xe35   :  { %1258 = vrot.lane.b32.xlu1 %v1251_v53, %s1968_s17 }
 0xe3c   :  { %1358 = vrot.lane.b32.xlu2 %v1251_v53, %s1969_s19 }
 0xe8e   :  { %v1322_v55 = vpop.permute.xlu2 %1321 }
 0xe96   :  { %v1359_v59 = vpop.permute.xlu2 %1358 }
 0xea5   :  { %v1254_v43 = vpop.f32.mrf.mxu1 }
 0xea6   :  { %v1324_v56 = vpop.permute.xlu0 %1323  ;;  %1455 = vrot.lane.b32.xlu2 %v1254_v43, %s1966_s18  ;;  %1457 = vrot.lane.b32.xlu1 %v1254_v43, %s1967_s16 }
 0xea7   :  { %v1259_v40 = vpop.permute.xlu1 %1258  ;;  %1805 = vmatpush.xpose.msk.msrb.mxu1 %vm338_vm13, %v1324_v56 }
 0xea8   :  { %1802 = vmatpush.xpose.msk.msra.mxu2 %vm338_vm13, %v1259_v40 }
 0xeaa   :  { %1806 = vmatmul.msk.f32.vlgmr.msrb.gmra.mxu1 %vm338_vm13, %v1322_v55 }
 0xeab   :  { %1803 = vmatmul.msk.f32.vlgmr.msra.gmra.mxu2 %vm338_vm13, %v1251_v53 }
 0xeac   :  { %1379 = vmatpush.msrb.mxu2 %v1359_v59 }
 0xeae   :  { %1293 = vrot.lane.b32.xlu2 %v1251_v53, %s1970_s20 }
 0xeb6   :  { %1392 = vrot.lane.b32.xlu2 %v1254_v43, %s1968_s17 }
 0xf00   :  { %v1456_v5 = vpop.permute.xlu2 %1455 }
 0xf08   :  { %v1294_v57 = vpop.permute.xlu2 %1293 }
 0xf09   :  { %1314 = vmatpush.msra.mxu3 %v1294_v57 }
 0xf10   :  { %v1393_v60 = vpop.permute.xlu2 %1392 }
 0xf11   :  { %1808 = vmatpush.xpose.msk.msrb.mxu3 %vm338_vm13, %v1393_v60 }
 0xf18   :  { %v1458_v25 = vpop.permute.xlu1 %1457 }
 0xf19   :  { %1811 = vmatpush.xpose.msk.msra.mxu2 %vm338_vm13, %v1458_v25 }
 0xf27   :  { %v1346_v62 = vpop.f32.mrf.mxu1 }
 0xf28   :  { %v1349_v63 = vsel %vm338_vm13, %v1346_v62, -inf }
 0xf29   :  { %1350 = vmax.xlane.f32.xlu0 %v1349_v63 }
 0xf2e   :  { %v1281_v0 = vpop.f32.mrf.mxu2 }
 0xf2f   :  { %v1284_v1 = vsel %vm338_vm13, %v1281_v0, -inf }
 0xf30   :  { %1285 = vmax.xlane.f32.xlu1 %v1284_v1 }
 0xf3d   :  { %1492 = vrot.lane.b32.xlu0 %v1254_v43, %s1969_s19 }
 0xf49   :  { %1427 = vrot.lane.b32.xlu1 %v1254_v43, %s1970_s20 }
 0xf9c   :  { %v1351_v4 = vpop.xlane.xlu0 %1350 }
 0xf9d   :  { %v1352_v33 = vsub.f32 %v1346_v62, %v1351_v4 }
 0xf9f   :  { %v1353_v7 = vmul.f32 1.442695, %v1352_v33  ;;  %v1837_v33 = vld [vmem:[%s2664_s7 + $0x58] sm:$0xff] }
 0xfa1   :  { %1912 = vpow2.f32 %v1353_v7 }
 0xfa3   :  { %v1286_v8 = vpop.xlane.xlu1 %1285 }
 0xfa4   :  { %v1287_v10 = vsub.f32 %v1281_v0, %v1286_v8  ;;  %v1835_v8 = vld [vmem:[%s2664_s7 + $0x48] sm:$0xff] }
 0xfa6   :  { %v1288_v11 = vmul.f32 1.442695, %v1287_v10 }
 0xfa7   :  { %v1913_v12 = vpop.eup %1912 }
 0xfa8   :  { %1914 = vpow2.f32 %v1288_v11  ;;  %1807 = vmatmul.msk.f32.vlgmr.msrb.gmra.mxu2 %vm338_vm13, %v1913_v12  ;;  %v1355_v35 = vsel %vm338_vm13, %v1913_v12, 0.0  ;;  %v1834_v11 = vld [vmem:[%s2664_s7 + $0x40] sm:$0xff] }
 0xfa9   :  { %1650 = vmatpush.msrb.mxu2 %v1837_v33 }
 0xfae   :  { %v1915_v37 = vpop.eup %1914 }
 0xfaf   :  { %1804 = vmatmul.msk.f32.vlgmr.msra.gmra.mxu3 %vm338_vm13, %v1915_v37  ;;  %v1290_v13 = vsel %vm338_vm13, %v1915_v37, 0.0  ;;  %v1493_v14 = vpop.permute.xlu0 %1492 }
 0xfb0   :  { %1291 = vadd.xlane.f32.xlu1 %v1290_v13  ;;  %1812 = vmatmul.msk.f32.vlgmr.msra.gmra.mxu2 %vm338_vm13, %v1456_v5 }
 0xfb1   :  { %1513 = vmatpush.msra.mxu3 %v1493_v14 }
 0xfb7   :  { %1809 = vmatmul.msk.f32.vlgmr.msrb.gmra.mxu3 %vm338_vm13, %v1254_v43  ;;  %v1544_v43 = vperm.slane %v2395_v29, 6 }
 0xfbb   :  { %v1428_v44 = vpop.permute.xlu1 %1427 }
 0xfbc   :  { %1448 = vmatpush.msra.mxu1 %v1428_v44 }
 0xfbe   :  { %1565 = vmatpush.msrb.mxu1 %v1815_v39 }
 0xfc0   :  { %1566 = vmatpush.msrb.mxu1 %v1814_v41  ;;  %v1828_v41 = vld [vmem:[%s2667_s10 + $0x100] sm:$0xff] }
0x1023   :  { %v1292_v45 = vpop.xlane.xlu1 %1291 }
0x102b   :  { %v1381_v15 = vpop.f32.mrf.mxu2 }
0x1032   :  { %v1316_v16 = vpop.f32.mrf.mxu3 }
0x1033   :  { %v1480_v17 = vpop.f32.mrf.mxu2 }
0x1034   :  { %v1483_v18 = vsel %vm338_vm13, %v1480_v17, -inf }
0x1035   :  { %1484 = vmax.xlane.f32.xlu2 %v1483_v18 }
0x103a   :  { %v1415_v2 = vpop.f32.mrf.mxu3 }
0x103b   :  { %v1418_v20 = vsel %vm338_vm13, %v1415_v2, -inf }
0x103c   :  { %1419 = vmax.xlane.f32.xlu0 %v1418_v20 }
0x103d   :  { %1356 = vadd.xlane.f32.xlu2 %v1355_v35 }
0x10a8   :  { %v1485_v58 = vpop.xlane.xlu2 %1484 }
0x10a9   :  { %v1486_v61 = vsub.f32 %v1480_v17, %v1485_v58  ;;  %v2591_v58 = vld [vmem:[%s2659_s2 + $0x10] sm:$0x3] }
0x10ab   :  { %v1487_v21 = vmul.f32 1.442695, %v1486_v61  ;;  %v1625_v61 = vperm.slane %v2395_v29, 7  ;;  %v1829_v29 = vld [vmem:[%s2667_s10 + $0x108] sm:$0xff] }
0x10ad   :  { %1916 = vpow2.f32 %v1487_v21 }
0x10af   :  { %v1420_v22 = vpop.xlane.xlu0 %1419 }
0x10b0   :  { %v1421_v23 = vsub.f32 %v1415_v2, %v1420_v22  ;;  %v1357_v30 = vpop.xlane.xlu2 %1356 }
0x10b2   :  { %v1422_v6 = vmul.f32 1.442695, %v1421_v23  ;;  %v1628_v23 = vperm.slane %v2591_v58, 0 }
0x10b3   :  { %v1917_v24 = vpop.eup %1916 }
0x10b4   :  { %1918 = vpow2.f32 %v1422_v6  ;;  %1813 = vmatmul.msk.f32.vlgmr.msra.gmra.mxu3 %vm338_vm13, %v1917_v24  ;;  %v1489_v26 = vsel %vm338_vm13, %v1917_v24, 0.0 }
0x10b5   :  { %1490 = vadd.xlane.f32.xlu2 %v1489_v26  ;;  %1920 = vrcp.f32 %v1357_v30  ;;  %v1831_v26 = vld [vmem:[%s2667_s10 + $0x118] sm:$0xff] }
0x10b6   :  { %1922 = vrcp.f32 %v1292_v45  ;;  %1680 = vmatpush.msra.mxu0 %v1831_v26  ;;  %v1827_v45 = vld [vmem:[%s2667_s10 + $0xf8] sm:$0xff] }
0x10ba   :  { %v1919_v27 = vpop.eup %1918 }
0x10bb   :  { %1810 = vmatmul.msk.f32.vlgmr.msra.gmra.mxu1 %vm338_vm13, %v1919_v27  ;;  %v1424_v28 = vsel %vm338_vm13, %v1919_v27, 0.0  ;;  %v1921_v31 = vpop.eup %1920  ;;  %v1830_v27 = vld [vmem:[%s2667_s10 + $0x110] sm:$0xff] }
0x10bc   :  { %v1385_v34 = vmul.f32 %v1921_v31, %v1381_v15  ;;  %v1923_v47 = vpop.eup %1922  ;;  %1681 = vmatpush.msra.mxu0 %v1830_v27 }
0x10bd   :  { %1425 = vadd.xlane.f32.xlu2 %v1424_v28  ;;  %v1320_v38 = vmul.f32 %v1923_v47, %v1316_v16 }
0x10be   :  { %1682 = vmatpush.msra.mxu0 %v1829_v29 }
0x10c0   :  { %1683 = vmatpush.msra.mxu0 %v1828_v41 }
0x10c2   :  { %1684 = vmatpush.msra.mxu0 %v1827_v45 }
0x10d5   :  { %1387 = vrot.lane.b32.xlu2 %v1385_v34, %s1971_s21 }
0x1128   :  { %v1491_v42 = vpop.xlane.xlu2 %1490 }
0x1129   :  { %1924 = vrcp.f32 %v1491_v42 }
0x112f   :  { %v1925_v48 = vpop.eup %1924 }
0x1130   :  { %v1426_v46 = vpop.xlane.xlu2 %1425 }
0x1131   :  { %1926 = vrcp.f32 %v1426_v46 }
0x1137   :  { %v1515_v49 = vpop.f32.mrf.mxu3  ;;  %v1927_v9 = vpop.eup %1926 }
0x1138   :  { %v1519_v51 = vmul.f32 %v1925_v48, %v1515_v49  ;;  %v1388_v54 = vpop.permute.xlu2 %1387  ;;  %v1450_v52 = vpop.f32.mrf.mxu1  ;;  %v1825_v48 = vld [vmem:[%s2667_s10 + $0xe8] sm:$0xff]  ;;  %v1824_v49 = vld [vmem:[%s2667_s10 + $0xe0] sm:$0xff] }
0x1139   :  { %v1390_v50 = vsel %vm338_vm13, %v1320_v38, %v1388_v54  ;;  %v1454_v36 = vmul.f32 %v1927_v9, %v1450_v52  ;;  %v1822_v52 = vld [vmem:[%s2667_s10 + $0xd0] sm:$0xff] }
0x113a   :  { %1521 = vrot.lane.b32.xlu0 %v1519_v51, %s1971_s21  ;;  %1832 = vmatmul.msk.f32.vlgmr.msrb.gmra.mxu1 %vm368_vm3, %v1390_v50  ;;  %v1823_v50 = vld [vmem:[%s2667_s10 + $0xd8] sm:$0xff] }
0x11ac   :  { %v1522_v53 = vpop.permute.xlu0 %1521 }
0x11ad   :  { %v1524_v55 = vsel %vm338_vm13, %v1454_v36, %v1522_v53  ;;  %v1821_v36 = vld [vmem:[%s2667_s10 + $0xc8] sm:$0xff] }
0x11ae   :  { %1833 = vmatmul.msk.f32.gmra.mxu1 %vm368_vm3, %v1524_v55  ;;  %v1820_v55 = vld [vmem:[%s2667_s10 + $0xc0] sm:$0xff] }
0x11b7   :  { %v1568_v56 = vpop.f32.mrf.mxu1 }
0x11b8   :  { %v1569_v40 = vadd.f32 %v1568_v56, %v1544_v43  ;;  %v1818_v56 = vld [vmem:[%s2667_s10 + $0xb0] sm:$0xff] }
0x11ba   :  { %v2560_v59 = vadd.f32 %v1569_v40, %v2483_v3  ;;  %v1817_v40 = vld [vmem:[%s2667_s10 + $0xa8] sm:$0xff] }
0x11bc   :  { %v1581_v5 = vsel %vm153_vm1, %v2560_v59, 0.0 }
0x11bd   :  { %1582 = vadd.xlane.f32.xlu0 %v1581_v5  ;;  %v1816_v5 = vld [vmem:[%s2667_s10 + $0xa0] sm:$0xff] }
0x122b   :  { %v1571_v57 = vpop.f32.mrf.mxu1 }
0x122c   :  { %v1572_v60 = vadd.f32 %v1571_v57, %v1544_v43  ;;  %v1819_v43 = vld [vmem:[%s2667_s10 + $0xb8] sm:$0xff]  ;;  %v1938_v57 = vld [vmem:[%s2660_s3] sm:$0x7]  ;;  %s1973_s3 = smov [#allocation2]  }
0x122e   :  { %v2565_v25 = vadd.f32 %v1572_v60, %v2488_v32  ;;  %v1836_v32 = vld [vmem:[%s2664_s7 + $0x50] sm:$0xff]  ;;  %v1631_v60 = vperm.slane %v1938_v57, 2 }
0x122f   :  { %1651 = vmatpush.msrb.mxu2 %v1836_v32 }
0x1230   :  { %v1583_v62 = vpop.xlane.xlu0 %1582  ;;  %v1584_v63 = vsel %vm153_vm1, %v2565_v25, 0.0 }
0x1231   :  { %v1587_v0 = vmul.f32 %v1583_v62, %v2056_v19  ;;  %1585 = vadd.xlane.f32.xlu2 %v1584_v63  ;;  %1652 = vmatpush.msrb.mxu2 %v1835_v8 }
0x1233   :  { %v1589_v1 = vsub.f32 %v2560_v59, %v1587_v0  ;;  %1653 = vmatpush.msrb.mxu2 %v1834_v11 }
0x1235   :  { %v1591_v3 = vmul.f32 %v1589_v1, %v1589_v1 }
0x1237   :  { %v1593_v4 = vsel %vm153_vm1, %v1591_v3, 0.0 }
0x1238   :  { %1594 = vadd.xlane.f32.xlu1 %v1593_v4 }
0x12a4   :  { %v1586_v7 = vpop.xlane.xlu2 %1585 }
0x12a5   :  { %v1588_v10 = vmul.f32 %v1586_v7, %v2056_v19 }
0x12a7   :  { %v1590_v12 = vsub.f32 %v2565_v25, %v1588_v10 }
0x12a9   :  { %v1592_v37 = vmul.f32 %v1590_v12, %v1590_v12 }
0x12ab   :  { %v1595_v13 = vpop.xlane.xlu1 %1594  ;;  %v1596_v14 = vsel %vm153_vm1, %v1592_v37, 0.0 }
0x12ac   :  { %v1599_v44 = vmul.f32 %v1595_v13, %v2056_v19  ;;  %1597 = vadd.xlane.f32.xlu1 %v1596_v14 }
0x12ae   :  { %v1601_v15 = vadd.f32 1e-05, %v1599_v44 }
0x12b0   :  { %1928 = vrsqrt.f32 %v1601_v15  ;;  %vm1609_vm3 = vweird.f32 %v1601_v15 }
0x12b6   :  { %v1929_v16 = vpop.eup %1928 }
0x12b7   :  { %v1604_v17 = vmul.f32 %v1929_v16, %v1601_v15  ;;  %vm1610_vm13 = vweird.f32 %v1929_v16 }
0x12b8   :  { %vm1611_vm15 = vmor %vm1609_vm3, %vm1610_vm13 }
0x12b9   :  { %v1605_v18 = vmul.f32 %v1929_v16, %v1604_v17 }
0x12bb   :  { %v1606_v2 = vmul.f32 0.5, %v1605_v18 }
0x12bd   :  { %v1607_v20 = vsub.f32 1.5, %v1606_v2 }
0x12bf   :  { %v1608_v35 = vmul.f32 %v1929_v16, %v1607_v20  ;;  %v1679_v20 = vperm.slane %v2591_v58, 1 }
0x12c1   :  { %v1612_v21 = vsel %vm1611_vm15, %v1929_v16, %v1608_v35 }
0x12c2   :  { %v1623_v22 = vmul.f32 %v1612_v21, %v1589_v1 }
0x12c4   :  { %v1626_v6 = vmul.f32 %v1625_v61, %v1623_v22  ;;  %v1972_v22 = vmov 8.0  }
0x12c6   :  { %v1629_v24 = vadd.f32 %v1628_v23, %v1626_v6 }
0x12c8   :  { %1838 = vmatmul.msk.f32.vlgmr.msrb.gmra.mxu2 %vm153_vm1, %v1629_v24 }
0x131f   :  { %v1598_v28 = vpop.xlane.xlu1 %1597 }
0x1320   :  { %v1600_v30 = vmul.f32 %v1598_v28, %v2056_v19  ;;  %v1826_v19 = vld [vmem:[%s2667_s10 + $0xf0] sm:$0xff]  ;;  %s1737_s10 = sshll.u32 %s1973_s3, 4  ;;  %s1738_s10 = int_to_ptr.vmem [resolvable:$true] %s1737_s10 }
0x1321   :  { %1685 = vmatpush.msra.mxu0 %v1826_v19 }
0x1322   :  { %v1602_v31 = vadd.f32 1e-05, %v1600_v30 }
0x1323   :  { %1686 = vmatpush.msra.mxu0 %v1825_v48 }
0x1324   :  { %1930 = vrsqrt.f32 %v1602_v31  ;;  %vm1619_vm0 = vweird.f32 %v1602_v31 }
0x1325   :  { %1687 = vmatpush.msra.mxu0 %v1824_v49 }
0x1327   :  { %1688 = vmatpush.msra.mxu0 %v1823_v50 }
0x1329   :  { %1689 = vmatpush.msra.mxu0 %v1822_v52 }
0x132a   :  { %v1931_v34 = vpop.eup %1930 }
0x132b   :  { %v1614_v39 = vmul.f32 %v1931_v34, %v1602_v31  ;;  %vm1620_vm2 = vweird.f32 %v1931_v34  ;;  %1690 = vmatpush.msra.mxu0 %v1821_v36 }
0x132c   :  { %vm1621_vm4 = vmor %vm1619_vm0, %vm1620_vm2 }
0x132d   :  { %v1615_v42 = vmul.f32 %v1931_v34, %v1614_v39  ;;  %1691 = vmatpush.msra.mxu0 %v1820_v55 }
0x132f   :  { %v1616_v46 = vmul.f32 0.5, %v1615_v42  ;;  %1692 = vmatpush.msra.mxu0 %v1819_v43 }
0x1331   :  { %v1617_v47 = vsub.f32 1.5, %v1616_v46  ;;  %1693 = vmatpush.msra.mxu0 %v1818_v56 }
0x1333   :  { %v1618_v38 = vmul.f32 %v1931_v34, %v1617_v47  ;;  %1694 = vmatpush.msra.mxu0 %v1817_v40 }
0x1335   :  { %v1622_v51 = vsel %vm1621_vm4, %v1931_v34, %v1618_v38  ;;  %1695 = vmatpush.msra.mxu0 %v1816_v5 }
0x1336   :  { %v1624_v54 = vmul.f32 %v1622_v51, %v1590_v12 }
0x1338   :  { %v1627_v9 = vmul.f32 %v1625_v61, %v1624_v54 }
0x133a   :  { %v1630_v53 = vadd.f32 %v1628_v23, %v1627_v9 }
0x133c   :  { %1839 = vmatmul.msk.f32.gmra.mxu2 %vm153_vm1, %v1630_v53 }
0x134b   :  { %v1655_v62 = vpop.f32.mrf.mxu2 }
0x134c   :  { %v1656_v63 = vadd.f32 %v1655_v62, %v1631_v60 }
0x134e   :  { %v1661_v0 = vmul.f32 %v1656_v63, %v1656_v63 }
0x1350   :  { %v1663_v1 = vmul.f32 %v1661_v0, %v1656_v63 }
0x1352   :  { %v1665_v3 = vmul.f32 0.044715, %v1663_v1 }
0x1354   :  { %v1667_v4 = vadd.f32 %v1665_v3, %v1656_v63 }
0x1356   :  { %v1669_v33 = vmul.f32 0.7978846, %v1667_v4 }
0x1358   :  { %1932 = vtanh.f32 %v1669_v33 }
0x135e   :  { %v1933_v32 = vpop.eup %1932 }
0x135f   :  { %v1673_v7 = vadd.f32 1.0, %v1933_v32 }
0x1361   :  { %v1675_v8 = vmul.f32 0.5, %v1673_v7 }
0x1363   :  { %v1677_v10 = vmul.f32 %v1675_v8, %v1656_v63 }
0x1365   :  { %1696 = vmatmul.f32.vlgmr.msra.gmra.mxu0 %v1677_v10 }
0x13bf   :  { %v1658_v11 = vpop.f32.mrf.mxu2 }
0x13c0   :  { %v1659_v12 = vadd.f32 %v1658_v11, %v1631_v60 }
0x13c2   :  { %v1662_v37 = vmul.f32 %v1659_v12, %v1659_v12 }
0x13c4   :  { %v1664_v13 = vmul.f32 %v1662_v37, %v1659_v12 }
0x13c6   :  { %v1666_v14 = vmul.f32 0.044715, %v1664_v13 }
0x13c8   :  { %v1668_v44 = vadd.f32 %v1666_v14, %v1659_v12 }
0x13ca   :  { %v1670_v15 = vmul.f32 0.7978846, %v1668_v44 }
0x13cc   :  { %1934 = vtanh.f32 %v1670_v15 }
0x13cd   :  { %1936 = vrcp.f32 %v1972_v22 }
0x13d2   :  { %v1935_v16 = vpop.eup %1934 }
0x13d3   :  { %v1674_v17 = vadd.f32 1.0, %v1935_v16  ;;  %v1937_v24 = vpop.eup %1936 }
0x13d4   :  { %v1713_v27 = vmul.f32 8.0, %v1937_v24  ;;  %vm1717_vm5 = vweird.f32 %v1937_v24 }
0x13d5   :  { %v1676_v18 = vmul.f32 0.5, %v1674_v17 }
0x13d6   :  { %v1714_v34 = vsub.f32 1.0, %v1713_v27 }
0x13d7   :  { %v1678_v2 = vmul.f32 %v1676_v18, %v1659_v12 }
0x13d8   :  { %v1715_v42 = vmul.f32 %v1937_v24, %v1714_v34 }
0x13d9   :  { %1699 = vmatmul.f32.gmra.mxu0 %v1678_v2 }
0x13da   :  { %v1716_v19 = vadd.f32 %v1937_v24, %v1715_v42 }
0x13dc   :  { %v1718_v49 = vsel %vm1717_vm5, %v1937_v24, %v1716_v19 }
0x13e2   :  { %v1697_v35 = vpop.f32.mrf.mxu0 }
0x13e3   :  { %v1698_v61 = vadd.f32 %v1697_v35, %v1679_v20 }
0x13e5   :  { %v1703_v21 = vadd.f32 %v1698_v61, %v2560_v59 }
0x13e7   :  { %v1705_v23 = vsel %vm153_vm1, %v1703_v21, 0.0 }
0x13e8   :  { %v1706_v6 = vrot.slane %v1705_v23, 4 }
0x13ea   :  { %v1707_v26 = vadd.f32 %v1706_v6, %v1705_v23 }
0x13ec   :  { %v1708_v30 = vrot.slane %v1707_v26, 2 }
0x13ee   :  { %v1709_v39 = vadd.f32 %v1708_v30, %v1707_v26 }
0x13f0   :  { %v1710_v45 = vrot.slane %v1709_v39, 1 }
0x13f2   :  { %v1711_v48 = vadd.f32 %v1710_v45, %v1709_v39 }
0x1456   :  { %v1700_v29 = vpop.f32.mrf.mxu0 }
0x1457   :  { %v1701_v28 = vadd.f32 %v1700_v29, %v1679_v20 }
0x1459   :  { %v1704_v31 = vadd.f32 %v1701_v28, %v2565_v25  ;;  %v1719_v25 = vmul.f32 %v1718_v49, %v1711_v48 }
0x145b   :  { %v1720_v58 = vsel %vm153_vm1, %v1704_v31, 0.0  ;;  %vm1728_vm1 = vcmask 1040384  }
0x145c   :  { %v1721_v41 = vrot.slane %v1720_v58, 4 }
0x145e   :  { %v1722_v59 = vadd.f32 %v1721_v41, %v1720_v58 }
0x1460   :  { %v1723_v46 = vrot.slane %v1722_v59, 2 }
0x1462   :  { %v1724_v47 = vadd.f32 %v1723_v46, %v1722_v59 }
0x1464   :  { %v1725_v38 = vrot.slane %v1724_v47, 1 }
0x1466   :  { %v1726_v51 = vadd.f32 %v1725_v38, %v1724_v47 }
0x1468   :  { %v1727_v54 = vmul.f32 %v1726_v51, %v1718_v49 }
0x146a   :  { %v1729_v50 = vsel %vm1728_vm1, %v1719_v25, %v1727_v54 }
0x146b   :  { %1731 = vst.msk [vmem:[#allocation2] sm:$0x3] %vm1730_vm6, %v1729_v50 }
0x146c   :  { %1742 = dma.vmem_to_hbm [thread:$0]  %s1738_s10, 32, %s1740_s29, [#allocation3]  }
0x146d   :  { %1963 = dma.done.wait [#allocation3], 32  }
0x146e   :  { %1964 = vsyncadd [#allocation3], 4294967264 }
0x146f   :  { %1747 = vsyncpa [#allocation3], 1 }

</bundles_post_ra>
